<compile_context>
chip_gen: v7x
topology: tpu7x:2x2x1
jax: 0.10.0
libtpu: 0.0.40
codegen_flags: <defaults>
</compile_context>

<pallas_src>
import math

import jax
import jax.numpy as jnp
from jax import lax
from jax.experimental import pallas as pl
from jax.experimental.pallas import tpu as pltpu

# ---- scaled-down RoBERTa config (roberta-base is 768 hidden / 12 layers / 12 heads;
# ---- shrunk to small TPU-friendly shapes as allowed by the prompt) ----
VOCAB      = 64
MAX_POS    = 32
TYPE_VOCAB = 1
HIDDEN     = 128
N_LAYERS   = 2
N_HEADS    = 2
HEAD_DIM   = HIDDEN // N_HEADS
FFN        = 256
N_CLASSES  = 2
LN_EPS     = 1e-5
PAD_ID     = 1


# --------------------------- in-kernel helpers ---------------------------------
def _layer_norm(x, g, b):
    mu = jnp.mean(x, axis=-1, keepdims=True)
    xc = x - mu
    var = jnp.mean(xc * xc, axis=-1, keepdims=True)
    return xc * lax.rsqrt(var + LN_EPS) * g + b


def _gelu(y):
    # tanh-approx GELU (HF roberta uses erf GELU; numerics differ by ~1e-3)
    return 0.5 * y * (1.0 + jnp.tanh(0.7978845608028654 * (y + 0.044715 * y * y * y)))


# --------------------------- single fused forward kernel -----------------------
def _roberta_fused_kernel(
        emb_ref, eg_ref, ebias_ref, mask_ref,
        wqkv_ref, bqkv_ref, wo_ref, bo_ref, l1g_ref, l1b_ref,
        w1_ref, b1_ref, w2_ref, b2_ref, l2g_ref, l2b_ref,
        prew_ref, preb_ref, clsw_ref, clsb_ref,
        out_ref,
        x_vmem):
    l = pl.program_id(0)
    B, S = mask_ref.shape

    # ----- embedding LayerNorm (no residual, no zero array), first grid step only -----
    @pl.when(l == 0)
    def _():
        x_vmem[...] = _layer_norm(emb_ref[...], eg_ref[...], ebias_ref[...])

    x = x_vmem[...]                                                      # (B*S, H)

    # ----- fused QKV projection: one (B*S, H) @ (H, 3H) matmul -----
    qkv = jnp.dot(x, wqkv_ref[0], preferred_element_type=jnp.float32) + bqkv_ref[0]
    q = qkv[:, 0:HIDDEN]
    k = qkv[:, HIDDEN:2 * HIDDEN]
    v = qkv[:, 2 * HIDDEN:3 * HIDDEN]

    # ----- self-attention: static python loops over (batch, head); tiles stay in vregs -----
    scale = 1.0 / math.sqrt(HEAD_DIM)
    mask = mask_ref[...]                                                 # (B, S) additive bias
    batch_ctx = []
    for b in range(B):
        bias_b = mask[b:b + 1, :]                                        # (1, S) over keys
        r0, r1 = b * S, (b + 1) * S
        head_ctx = []
        for h in range(N_HEADS):
            c0, c1 = h * HEAD_DIM, (h + 1) * HEAD_DIM
            qbh = q[r0:r1, c0:c1]                                        # (S, D)
            kbh = k[r0:r1, c0:c1]
            vbh = v[r0:r1, c0:c1]
            s = lax.dot_general(qbh, kbh, (((1,), (1,)), ((), ())),
                                preferred_element_type=jnp.float32) * scale + bias_b
            mmax = jnp.max(s, axis=-1, keepdims=True)
            p = jnp.exp(s - mmax)
            p = p * pl.reciprocal(jnp.sum(p, axis=-1, keepdims=True), approx=True)
            head_ctx.append(jnp.dot(p, vbh, preferred_element_type=jnp.float32))
        batch_ctx.append(jnp.concatenate(head_ctx, axis=1))              # (S, H)
    ctx = jnp.concatenate(batch_ctx, axis=0)                             # (B*S, H)

    # ----- attention output projection + residual + LayerNorm (fused epilogue) -----
    attn_out = jnp.dot(ctx, wo_ref[0], preferred_element_type=jnp.float32) + bo_ref[0]
    x = _layer_norm(attn_out + x, l1g_ref[0], l1b_ref[0])

    # ----- FFN: w1 + GELU + w2 + residual + LayerNorm (fused epilogue) -----
    hmid = _gelu(jnp.dot(x, w1_ref[0], preferred_element_type=jnp.float32) + b1_ref[0])
    ffn_out = jnp.dot(hmid, w2_ref[0], preferred_element_type=jnp.float32) + b2_ref[0]
    x = _layer_norm(ffn_out + x, l2g_ref[0], l2b_ref[0])

    x_vmem[...] = x                                                      # carry to next layer

    # ----- classifier head, fused into the last grid step -----
    @pl.when(l == pl.num_programs(0) - 1)
    def _():
        # pooler = hidden_state[:, 0]  (CLS rows 0, S, 2S, ...)
        pooled = jnp.concatenate([x[b * S:b * S + 1, :] for b in range(B)], axis=0)  # (B, H)
        h1 = jnp.dot(pooled, prew_ref[...], preferred_element_type=jnp.float32) + preb_ref[...]
        h1 = jnp.maximum(h1, 0.0)                                        # ReLU
        # TODO(synk): Dropout(p=0.3) is stochastic at train time; identity here (eval mode).
        logits = jnp.dot(h1, clsw_ref[...], preferred_element_type=jnp.float32) + clsb_ref[...]
        mx = jnp.max(logits, axis=1, keepdims=True)
        e = jnp.exp(logits - mx)
        # exact divide for the returned probabilities (rows must sum to 1)
        out_ref[...] = (e / jnp.sum(e, axis=1, keepdims=True)).astype(out_ref.dtype)


# --------------------------- pallas_call wrapper --------------------------------
def _inv_spec(shape):
    n = len(shape)
    return pl.BlockSpec(tuple(shape), lambda l, n=n: (0,) * n)


def _layer_spec(shape):
    n = len(shape)
    return pl.BlockSpec((1,) + tuple(shape), lambda l, n=n: (l,) + (0,) * n)


def fused_roberta_call(params, emb, mask_bias):
    M, H = emb.shape
    B, S = mask_bias.shape
    F, C, L = FFN, N_CLASSES, N_LAYERS

    grid_spec = pltpu.PrefetchScalarGridSpec(
        num_scalar_prefetch=0,
        grid=(L,),
        in_specs=[
            _inv_spec((M, H)),                                   # embeddings (layer-invariant)
            _inv_spec((1, H)), _inv_spec((1, H)),                # embedding LN gamma / beta
            _inv_spec((B, S)),                                   # additive attention mask bias
            _layer_spec((H, 3 * H)), _layer_spec((1, 3 * H)),    # fused QKV weight / bias
            _layer_spec((H, H)), _layer_spec((1, H)),            # attention output proj
            _layer_spec((1, H)), _layer_spec((1, H)),            # LN1 gamma / beta
            _layer_spec((H, F)), _layer_spec((1, F)),            # FFN w1 / b1
            _layer_spec((F, H)), _layer_spec((1, H)),            # FFN w2 / b2
            _layer_spec((1, H)), _layer_spec((1, H)),            # LN2 gamma / beta
            _inv_spec((H, H)), _inv_spec((1, H)),                # pre_classifier
            _inv_spec((H, C)), _inv_spec((1, C)),                # classifier
        ],
        out_specs=pl.BlockSpec((B, C), lambda l: (0, 0)),
        scratch_shapes=[pltpu.VMEM((M, H), jnp.float32)],        # resident activation slab
    )
    return pl.pallas_call(
        _roberta_fused_kernel,
        out_shape=jax.ShapeDtypeStruct((B, C), jnp.float32),
        grid_spec=grid_spec,
        compiler_params=pltpu.CompilerParams(
            dimension_semantics=("arbitrary",)),                 # layer axis carries state
    )(emb, params["emb_ln_g"], params["emb_ln_b"], mask_bias,
      params["wqkv"], params["bqkv"], params["wo"], params["bo"],
      params["ln1_g"], params["ln1_b"],
      params["w1"], params["b1"], params["w2"], params["b2"],
      params["ln2_g"], params["ln2_b"],
      params["pre_w"], params["pre_b"], params["cls_w"], params["cls_b"])


# --------------------------- parameters -----------------------------------------
def init_params(key):
    # TODO(synk): real module loads pretrained 'roberta-base'; weights are deterministic random here.
    keys = iter(jax.random.split(key, 16))

    def dense(*shape):
        return jax.random.normal(next(keys), shape, jnp.float32) * 0.02

    H, F, L, C = HIDDEN, FFN, N_LAYERS, N_CLASSES
    return {
        "word_emb": dense(VOCAB, H),
        "pos_emb":  dense(MAX_POS, H),
        "type_emb": dense(TYPE_VOCAB, H),
        "emb_ln_g": jnp.ones((1, H), jnp.float32),
        "emb_ln_b": jnp.zeros((1, H), jnp.float32),
        # per-layer weights stacked along a leading layer axis; q/k/v fused
        "wqkv": dense(L, H, 3 * H), "bqkv": jnp.zeros((L, 1, 3 * H), jnp.float32),
        "wo":   dense(L, H, H),     "bo":   jnp.zeros((L, 1, H), jnp.float32),
        "ln1_g": jnp.ones((L, 1, H), jnp.float32), "ln1_b": jnp.zeros((L, 1, H), jnp.float32),
        "w1":   dense(L, H, F),     "b1":   jnp.zeros((L, 1, F), jnp.float32),
        "w2":   dense(L, F, H),     "b2":   jnp.zeros((L, 1, H), jnp.float32),
        "ln2_g": jnp.ones((L, 1, H), jnp.float32), "ln2_b": jnp.zeros((L, 1, H), jnp.float32),
        # head: pre_classifier Linear(768,768) -> (H,H); classifier Linear(768,2) -> (H,C)
        "pre_w": dense(H, H), "pre_b": jnp.zeros((1, H), jnp.float32),
        "cls_w": dense(H, C), "cls_b": jnp.zeros((1, C), jnp.float32),
    }


# --------------------------- forward pass ----------------------------------------
def roberta_class_forward(params, input_ids, attention_mask, token_type_ids):
    B, S = input_ids.shape

    # RoBERTa-style position ids: cumsum of non-pad positions, offset by pad id.
    mask_ne = (input_ids != PAD_ID).astype(jnp.int32)
    position_ids = jnp.cumsum(mask_ne, axis=1) * mask_ne + PAD_ID

    # Embedding gathers stay in XLA (data-dependent gather has no clean BlockSpec form).
    emb = (jnp.take(params["word_emb"], input_ids, axis=0)
           + jnp.take(params["pos_emb"], position_ids, axis=0)
           + jnp.take(params["type_emb"], token_type_ids, axis=0))
    emb = emb.reshape(B * S, HIDDEN).astype(jnp.float32)

    # HF extended attention mask: (1 - mask) * big_negative, additive over keys.
    mask_bias = (1.0 - attention_mask.astype(jnp.float32)) * -1e9       # (B, S)

    # Everything else (emb LN, all encoder layers, pooling, classifier head, softmax)
    # runs in ONE fused pallas_call.
    return fused_roberta_call(params, emb, mask_bias)


# --------------------------- main -------------------------------------------------
if __name__ == "__main__":
    B, S = 2, 8
    key = jax.random.PRNGKey(0)
    k_param, k_ids = jax.random.split(key)

    params = init_params(k_param)
    input_ids = jax.random.randint(k_ids, (B, S), 2, VOCAB, dtype=jnp.int32)  # avoid pad id 1
    attention_mask = jnp.ones((B, S), jnp.int32)
    token_type_ids = jnp.zeros((B, S), jnp.int32)

    fwd = jax.jit(roberta_class_forward)
    out = fwd(params, input_ids, attention_mask, token_type_ids)
    out = jax.block_until_ready(out)

    assert out.shape == (B, N_CLASSES), out.shape
    assert bool(jnp.all(jnp.isfinite(out)))
    # softmax rows must sum to 1
    assert bool(jnp.allclose(jnp.sum(out, axis=1), 1.0, atol=1e-5))
    print("KERNEL_OK")
</pallas_src>

<mosaic_0001>
module attributes {stable_mosaic.version = 11 : i64} {
  func.func @_roberta_fused_kernel(%arg0: i32, %arg1: memref<16x128xf32, #tpu.memory_space<vmem>>, %arg2: memref<1x128xf32, #tpu.memory_space<vmem>>, %arg3: memref<1x128xf32, #tpu.memory_space<vmem>>, %arg4: memref<2x8xf32, #tpu.memory_space<vmem>>, %arg5: memref<1x128x384xf32, #tpu.memory_space<vmem>>, %arg6: memref<1x1x384xf32, #tpu.memory_space<vmem>>, %arg7: memref<1x128x128xf32, #tpu.memory_space<vmem>>, %arg8: memref<1x1x128xf32, #tpu.memory_space<vmem>>, %arg9: memref<1x1x128xf32, #tpu.memory_space<vmem>>, %arg10: memref<1x1x128xf32, #tpu.memory_space<vmem>>, %arg11: memref<1x128x256xf32, #tpu.memory_space<vmem>>, %arg12: memref<1x1x256xf32, #tpu.memory_space<vmem>>, %arg13: memref<1x256x128xf32, #tpu.memory_space<vmem>>, %arg14: memref<1x1x128xf32, #tpu.memory_space<vmem>>, %arg15: memref<1x1x128xf32, #tpu.memory_space<vmem>>, %arg16: memref<1x1x128xf32, #tpu.memory_space<vmem>>, %arg17: memref<128x128xf32, #tpu.memory_space<vmem>>, %arg18: memref<1x128xf32, #tpu.memory_space<vmem>>, %arg19: memref<128x2xf32, #tpu.memory_space<vmem>>, %arg20: memref<1x2xf32, #tpu.memory_space<vmem>>, %arg21: memref<2x2xf32, #tpu.memory_space<vmem>>, %arg22: memref<16x128xf32, #tpu.memory_space<vmem>>) attributes {dimension_semantics = [#tpu.dimension_semantics<arbitrary>], iteration_bounds = array<i64: 2>, scalar_prefetch = 0 : i64, scratch_operands = 1 : i64, tpu.core_type = #tpu.core_type<tc>, window_params = [{pipeline_mode = #tpu.pipeline_mode<synchronous>, transform_indices = @transform_0, window_bounds = array<i64: 16, 128>}, {pipeline_mode = #tpu.pipeline_mode<synchronous>, transform_indices = @transform_1, window_bounds = array<i64: 1, 128>}, {pipeline_mode = #tpu.pipeline_mode<synchronous>, transform_indices = @transform_2, window_bounds = array<i64: 1, 128>}, {pipeline_mode = #tpu.pipeline_mode<synchronous>, transform_indices = @transform_3, window_bounds = array<i64: 2, 8>}, {transform_indices = @transform_4, window_bounds = array<i64: 1, 128, 384>}, {transform_indices = @transform_5, window_bounds = array<i64: 1, 1, 384>}, {transform_indices = @transform_6, window_bounds = array<i64: 1, 128, 128>}, {transform_indices = @transform_7, window_bounds = array<i64: 1, 1, 128>}, {transform_indices = @transform_8, window_bounds = array<i64: 1, 1, 128>}, {transform_indices = @transform_9, window_bounds = array<i64: 1, 1, 128>}, {transform_indices = @transform_10, window_bounds = array<i64: 1, 128, 256>}, {transform_indices = @transform_11, window_bounds = array<i64: 1, 1, 256>}, {transform_indices = @transform_12, window_bounds = array<i64: 1, 256, 128>}, {transform_indices = @transform_13, window_bounds = array<i64: 1, 1, 128>}, {transform_indices = @transform_14, window_bounds = array<i64: 1, 1, 128>}, {transform_indices = @transform_15, window_bounds = array<i64: 1, 1, 128>}, {pipeline_mode = #tpu.pipeline_mode<synchronous>, transform_indices = @transform_16, window_bounds = array<i64: 128, 128>}, {pipeline_mode = #tpu.pipeline_mode<synchronous>, transform_indices = @transform_17, window_bounds = array<i64: 1, 128>}, {pipeline_mode = #tpu.pipeline_mode<synchronous>, transform_indices = @transform_18, window_bounds = array<i64: 128, 2>}, {pipeline_mode = #tpu.pipeline_mode<synchronous>, transform_indices = @transform_19, window_bounds = array<i64: 1, 2>}, {pipeline_mode = #tpu.pipeline_mode<synchronous>, transform_indices = @transform_20, window_bounds = array<i64: 2, 2>}]} {
    %c0_i32 = arith.constant 0 : i32
    %0 = arith.cmpi eq, %arg0, %c0_i32 : i32
    %1 = arith.extui %0 : i1 to i32
    %c0_i32_0 = arith.constant 0 : i32
    %2 = arith.cmpi ne, %1, %c0_i32_0 : i32
    scf.if %2 {
      %c0_80 = arith.constant 0 : index
      %c0_81 = arith.constant 0 : index
      %184 = vector.load %arg1[%c0_80, %c0_81] : memref<16x128xf32, #tpu.memory_space<vmem>>, vector<16x128xf32>
      %c0_82 = arith.constant 0 : index
      %c0_83 = arith.constant 0 : index
      %185 = vector.load %arg2[%c0_82, %c0_83] : memref<1x128xf32, #tpu.memory_space<vmem>>, vector<1x128xf32>
      %c0_84 = arith.constant 0 : index
      %c0_85 = arith.constant 0 : index
      %186 = vector.load %arg3[%c0_84, %c0_85] : memref<1x128xf32, #tpu.memory_space<vmem>>, vector<1x128xf32>
      %cst_86 = arith.constant dense<0.000000e+00> : vector<16xf32>
      %187 = vector.multi_reduction <add>, %184, %cst_86 [1] : vector<16x128xf32> to vector<16xf32>
      %188 = vector.shape_cast %187 : vector<16xf32> to vector<16x1xf32>
      %cst_87 = arith.constant 1.280000e+02 : f32
      %189 = vector.broadcast %cst_87 : f32 to vector<16x1xf32>
      %190 = arith.divf %188, %189 : vector<16x1xf32>
      %191 = vector.broadcast %190 : vector<16x1xf32> to vector<16x128xf32>
      %192 = arith.subf %184, %191 : vector<16x128xf32>
      %193 = arith.mulf %192, %192 : vector<16x128xf32>
      %cst_88 = arith.constant dense<0.000000e+00> : vector<16xf32>
      %194 = vector.multi_reduction <add>, %193, %cst_88 [1] : vector<16x128xf32> to vector<16xf32>
      %195 = vector.shape_cast %194 : vector<16xf32> to vector<16x1xf32>
      %cst_89 = arith.constant 1.280000e+02 : f32
      %196 = vector.broadcast %cst_89 : f32 to vector<16x1xf32>
      %197 = arith.divf %195, %196 : vector<16x1xf32>
      %cst_90 = arith.constant 9.99999974E-6 : f32
      %198 = vector.broadcast %cst_90 : f32 to vector<16x1xf32>
      %199 = arith.addf %197, %198 : vector<16x1xf32>
      %200 = math.rsqrt %199 : vector<16x1xf32>
      %201 = vector.broadcast %200 : vector<16x1xf32> to vector<16x128xf32>
      %202 = arith.mulf %192, %201 : vector<16x128xf32>
      %203 = vector.broadcast %185 : vector<1x128xf32> to vector<16x128xf32>
      %204 = arith.mulf %202, %203 : vector<16x128xf32>
      %205 = vector.broadcast %186 : vector<1x128xf32> to vector<16x128xf32>
      %206 = arith.addf %204, %205 : vector<16x128xf32>
      %c0_91 = arith.constant 0 : index
      %c0_92 = arith.constant 0 : index
      %207 = vector.load %arg22[%c0_91, %c0_92] : memref<16x128xf32, #tpu.memory_space<vmem>>, vector<16x128xf32>
      tpu.vector_store %arg22[%c0_91, %c0_92], %206 {strides = array<i32>} : memref<16x128xf32, #tpu.memory_space<vmem>>, vector<16x128xf32>,
    } else {
    }
    %c0 = arith.constant 0 : index
    %c0_1 = arith.constant 0 : index
    %3 = vector.load %arg22[%c0, %c0_1] : memref<16x128xf32, #tpu.memory_space<vmem>>, vector<16x128xf32>
    %c0_2 = arith.constant 0 : index
    %c0_3 = arith.constant 0 : index
    %c0_4 = arith.constant 0 : index
    %4 = vector.load %arg5[%c0_2, %c0_3, %c0_4] : memref<1x128x384xf32, #tpu.memory_space<vmem>>, vector<1x128x384xf32>
    %5 = vector.shape_cast %4 : vector<1x128x384xf32> to vector<128x384xf32>
    %cst = arith.constant dense<0.000000e+00> : vector<16x384xf32>
    %6 = tpu.matmul %3, %5, %cst {dimension_numbers = #tpu.dot_dimension_numbers<[1], [0], [0], [1], [0, 0, 1, 1], [], []>} : vector<16x128xf32>, vector<128x384xf32>, vector<16x384xf32> -> vector<16x384xf32>
    %c0_5 = arith.constant 0 : index
    %c0_6 = arith.constant 0 : index
    %c0_7 = arith.constant 0 : index
    %7 = vector.load %arg6[%c0_5, %c0_6, %c0_7] : memref<1x1x384xf32, #tpu.memory_space<vmem>>, vector<1x1x384xf32>
    %8 = vector.shape_cast %7 : vector<1x1x384xf32> to vector<1x384xf32>
    %9 = vector.broadcast %8 : vector<1x384xf32> to vector<16x384xf32>
    %10 = arith.addf %6, %9 : vector<16x384xf32>
    %11 = vector.extract_strided_slice %10 {offsets = [0, 0], sizes = [16, 128], strides = [1, 1]} : vector<16x384xf32> to vector<16x128xf32>
    %12 = vector.extract_strided_slice %10 {offsets = [0, 128], sizes = [16, 128], strides = [1, 1]} : vector<16x384xf32> to vector<16x128xf32>
    %13 = vector.extract_strided_slice %10 {offsets = [0, 256], sizes = [16, 128], strides = [1, 1]} : vector<16x384xf32> to vector<16x128xf32>
    %c0_8 = arith.constant 0 : index
    %c0_9 = arith.constant 0 : index
    %14 = vector.load %arg4[%c0_8, %c0_9] : memref<2x8xf32, #tpu.memory_space<vmem>>, vector<2x8xf32>
    %15 = vector.extract_strided_slice %14 {offsets = [0, 0], sizes = [1, 8], strides = [1, 1]} : vector<2x8xf32> to vector<1x8xf32>
    %16 = vector.extract_strided_slice %11 {offsets = [0, 0], sizes = [8, 64], strides = [1, 1]} : vector<16x128xf32> to vector<8x64xf32>
    %17 = vector.extract_strided_slice %12 {offsets = [0, 0], sizes = [8, 64], strides = [1, 1]} : vector<16x128xf32> to vector<8x64xf32>
    %18 = vector.extract_strided_slice %13 {offsets = [0, 0], sizes = [8, 64], strides = [1, 1]} : vector<16x128xf32> to vector<8x64xf32>
    %cst_10 = arith.constant dense<0.000000e+00> : vector<8x8xf32>
    %19 = tpu.matmul %16, %17, %cst_10 {dimension_numbers = #tpu.dot_dimension_numbers<[1], [1], [0], [0], [0, 0, 1, 0], [], []>} : vector<8x64xf32>, vector<8x64xf32>, vector<8x8xf32> -> vector<8x8xf32>
    %cst_11 = arith.constant 1.250000e-01 : f32
    %20 = vector.broadcast %cst_11 : f32 to vector<8x8xf32>
    %21 = arith.mulf %19, %20 : vector<8x8xf32>
    %22 = vector.broadcast %15 : vector<1x8xf32> to vector<8x8xf32>
    %23 = arith.addf %21, %22 : vector<8x8xf32>
    %cst_12 = arith.constant dense<0xFF800000> : vector<8xf32>
    %24 = vector.multi_reduction <maximumf>, %23, %cst_12 [1] : vector<8x8xf32> to vector<8xf32>
    %25 = vector.shape_cast %24 : vector<8xf32> to vector<8x1xf32>
    %26 = vector.broadcast %25 : vector<8x1xf32> to vector<8x8xf32>
    %27 = arith.subf %23, %26 : vector<8x8xf32>
    %28 = math.exp %27 : vector<8x8xf32>
    %cst_13 = arith.constant dense<0.000000e+00> : vector<8xf32>
    %29 = vector.multi_reduction <add>, %28, %cst_13 [1] : vector<8x8xf32> to vector<8xf32>
    %30 = vector.shape_cast %29 : vector<8xf32> to vector<8x1xf32>
    %31 = tpu.reciprocal %30 {approx = true} : vector<8x1xf32> -> vector<8x1xf32>
    %32 = vector.broadcast %31 : vector<8x1xf32> to vector<8x8xf32>
    %33 = arith.mulf %28, %32 : vector<8x8xf32>
    %cst_14 = arith.constant dense<0.000000e+00> : vector<8x64xf32>
    %34 = tpu.matmul %33, %18, %cst_14 {dimension_numbers = #tpu.dot_dimension_numbers<[1], [0], [0], [1], [0, 0, 1, 1], [], []>} : vector<8x8xf32>, vector<8x64xf32>, vector<8x64xf32> -> vector<8x64xf32>
    %35 = vector.extract_strided_slice %11 {offsets = [0, 64], sizes = [8, 64], strides = [1, 1]} : vector<16x128xf32> to vector<8x64xf32>
    %36 = vector.extract_strided_slice %12 {offsets = [0, 64], sizes = [8, 64], strides = [1, 1]} : vector<16x128xf32> to vector<8x64xf32>
    %37 = vector.extract_strided_slice %13 {offsets = [0, 64], sizes = [8, 64], strides = [1, 1]} : vector<16x128xf32> to vector<8x64xf32>
    %cst_15 = arith.constant dense<0.000000e+00> : vector<8x8xf32>
    %38 = tpu.matmul %35, %36, %cst_15 {dimension_numbers = #tpu.dot_dimension_numbers<[1], [1], [0], [0], [0, 0, 1, 0], [], []>} : vector<8x64xf32>, vector<8x64xf32>, vector<8x8xf32> -> vector<8x8xf32>
    %cst_16 = arith.constant 1.250000e-01 : f32
    %39 = vector.broadcast %cst_16 : f32 to vector<8x8xf32>
    %40 = arith.mulf %38, %39 : vector<8x8xf32>
    %41 = vector.broadcast %15 : vector<1x8xf32> to vector<8x8xf32>
    %42 = arith.addf %40, %41 : vector<8x8xf32>
    %cst_17 = arith.constant dense<0xFF800000> : vector<8xf32>
    %43 = vector.multi_reduction <maximumf>, %42, %cst_17 [1] : vector<8x8xf32> to vector<8xf32>
    %44 = vector.shape_cast %43 : vector<8xf32> to vector<8x1xf32>
    %45 = vector.broadcast %44 : vector<8x1xf32> to vector<8x8xf32>
    %46 = arith.subf %42, %45 : vector<8x8xf32>
    %47 = math.exp %46 : vector<8x8xf32>
    %cst_18 = arith.constant dense<0.000000e+00> : vector<8xf32>
    %48 = vector.multi_reduction <add>, %47, %cst_18 [1] : vector<8x8xf32> to vector<8xf32>
    %49 = vector.shape_cast %48 : vector<8xf32> to vector<8x1xf32>
    %50 = tpu.reciprocal %49 {approx = true} : vector<8x1xf32> -> vector<8x1xf32>
    %51 = vector.broadcast %50 : vector<8x1xf32> to vector<8x8xf32>
    %52 = arith.mulf %47, %51 : vector<8x8xf32>
    %cst_19 = arith.constant dense<0.000000e+00> : vector<8x64xf32>
    %53 = tpu.matmul %52, %37, %cst_19 {dimension_numbers = #tpu.dot_dimension_numbers<[1], [0], [0], [1], [0, 0, 1, 1], [], []>} : vector<8x8xf32>, vector<8x64xf32>, vector<8x64xf32> -> vector<8x64xf32>
    %54 = tpu.concatenate %34, %53 in 1 : vector<8x64xf32>, vector<8x64xf32> -> vector<8x128xf32>
    %55 = vector.extract_strided_slice %14 {offsets = [1, 0], sizes = [1, 8], strides = [1, 1]} : vector<2x8xf32> to vector<1x8xf32>
    %56 = vector.extract_strided_slice %11 {offsets = [8, 0], sizes = [8, 64], strides = [1, 1]} : vector<16x128xf32> to vector<8x64xf32>
    %57 = vector.extract_strided_slice %12 {offsets = [8, 0], sizes = [8, 64], strides = [1, 1]} : vector<16x128xf32> to vector<8x64xf32>
    %58 = vector.extract_strided_slice %13 {offsets = [8, 0], sizes = [8, 64], strides = [1, 1]} : vector<16x128xf32> to vector<8x64xf32>
    %cst_20 = arith.constant dense<0.000000e+00> : vector<8x8xf32>
    %59 = tpu.matmul %56, %57, %cst_20 {dimension_numbers = #tpu.dot_dimension_numbers<[1], [1], [0], [0], [0, 0, 1, 0], [], []>} : vector<8x64xf32>, vector<8x64xf32>, vector<8x8xf32> -> vector<8x8xf32>
    %cst_21 = arith.constant 1.250000e-01 : f32
    %60 = vector.broadcast %cst_21 : f32 to vector<8x8xf32>
    %61 = arith.mulf %59, %60 : vector<8x8xf32>
    %62 = vector.broadcast %55 : vector<1x8xf32> to vector<8x8xf32>
    %63 = arith.addf %61, %62 : vector<8x8xf32>
    %cst_22 = arith.constant dense<0xFF800000> : vector<8xf32>
    %64 = vector.multi_reduction <maximumf>, %63, %cst_22 [1] : vector<8x8xf32> to vector<8xf32>
    %65 = vector.shape_cast %64 : vector<8xf32> to vector<8x1xf32>
    %66 = vector.broadcast %65 : vector<8x1xf32> to vector<8x8xf32>
    %67 = arith.subf %63, %66 : vector<8x8xf32>
    %68 = math.exp %67 : vector<8x8xf32>
    %cst_23 = arith.constant dense<0.000000e+00> : vector<8xf32>
    %69 = vector.multi_reduction <add>, %68, %cst_23 [1] : vector<8x8xf32> to vector<8xf32>
    %70 = vector.shape_cast %69 : vector<8xf32> to vector<8x1xf32>
    %71 = tpu.reciprocal %70 {approx = true} : vector<8x1xf32> -> vector<8x1xf32>
    %72 = vector.broadcast %71 : vector<8x1xf32> to vector<8x8xf32>
    %73 = arith.mulf %68, %72 : vector<8x8xf32>
    %cst_24 = arith.constant dense<0.000000e+00> : vector<8x64xf32>
    %74 = tpu.matmul %73, %58, %cst_24 {dimension_numbers = #tpu.dot_dimension_numbers<[1], [0], [0], [1], [0, 0, 1, 1], [], []>} : vector<8x8xf32>, vector<8x64xf32>, vector<8x64xf32> -> vector<8x64xf32>
    %75 = vector.extract_strided_slice %11 {offsets = [8, 64], sizes = [8, 64], strides = [1, 1]} : vector<16x128xf32> to vector<8x64xf32>
    %76 = vector.extract_strided_slice %12 {offsets = [8, 64], sizes = [8, 64], strides = [1, 1]} : vector<16x128xf32> to vector<8x64xf32>
    %77 = vector.extract_strided_slice %13 {offsets = [8, 64], sizes = [8, 64], strides = [1, 1]} : vector<16x128xf32> to vector<8x64xf32>
    %cst_25 = arith.constant dense<0.000000e+00> : vector<8x8xf32>
    %78 = tpu.matmul %75, %76, %cst_25 {dimension_numbers = #tpu.dot_dimension_numbers<[1], [1], [0], [0], [0, 0, 1, 0], [], []>} : vector<8x64xf32>, vector<8x64xf32>, vector<8x8xf32> -> vector<8x8xf32>
    %cst_26 = arith.constant 1.250000e-01 : f32
    %79 = vector.broadcast %cst_26 : f32 to vector<8x8xf32>
    %80 = arith.mulf %78, %79 : vector<8x8xf32>
    %81 = vector.broadcast %55 : vector<1x8xf32> to vector<8x8xf32>
    %82 = arith.addf %80, %81 : vector<8x8xf32>
    %cst_27 = arith.constant dense<0xFF800000> : vector<8xf32>
    %83 = vector.multi_reduction <maximumf>, %82, %cst_27 [1] : vector<8x8xf32> to vector<8xf32>
    %84 = vector.shape_cast %83 : vector<8xf32> to vector<8x1xf32>
    %85 = vector.broadcast %84 : vector<8x1xf32> to vector<8x8xf32>
    %86 = arith.subf %82, %85 : vector<8x8xf32>
    %87 = math.exp %86 : vector<8x8xf32>
    %cst_28 = arith.constant dense<0.000000e+00> : vector<8xf32>
    %88 = vector.multi_reduction <add>, %87, %cst_28 [1] : vector<8x8xf32> to vector<8xf32>
    %89 = vector.shape_cast %88 : vector<8xf32> to vector<8x1xf32>
    %90 = tpu.reciprocal %89 {approx = true} : vector<8x1xf32> -> vector<8x1xf32>
    %91 = vector.broadcast %90 : vector<8x1xf32> to vector<8x8xf32>
    %92 = arith.mulf %87, %91 : vector<8x8xf32>
    %cst_29 = arith.constant dense<0.000000e+00> : vector<8x64xf32>
    %93 = tpu.matmul %92, %77, %cst_29 {dimension_numbers = #tpu.dot_dimension_numbers<[1], [0], [0], [1], [0, 0, 1, 1], [], []>} : vector<8x8xf32>, vector<8x64xf32>, vector<8x64xf32> -> vector<8x64xf32>
    %94 = tpu.concatenate %74, %93 in 1 : vector<8x64xf32>, vector<8x64xf32> -> vector<8x128xf32>
    %95 = tpu.concatenate %54, %94 in 0 : vector<8x128xf32>, vector<8x128xf32> -> vector<16x128xf32>
    %c0_30 = arith.constant 0 : index
    %c0_31 = arith.constant 0 : index
    %c0_32 = arith.constant 0 : index
    %96 = vector.load %arg7[%c0_30, %c0_31, %c0_32] : memref<1x128x128xf32, #tpu.memory_space<vmem>>, vector<1x128x128xf32>
    %97 = vector.shape_cast %96 : vector<1x128x128xf32> to vector<128x128xf32>
    %cst_33 = arith.constant dense<0.000000e+00> : vector<16x128xf32>
    %98 = tpu.matmul %95, %97, %cst_33 {dimension_numbers = #tpu.dot_dimension_numbers<[1], [0], [0], [1], [0, 0, 1, 1], [], []>} : vector<16x128xf32>, vector<128x128xf32>, vector<16x128xf32> -> vector<16x128xf32>
    %c0_34 = arith.constant 0 : index
    %c0_35 = arith.constant 0 : index
    %c0_36 = arith.constant 0 : index
    %99 = vector.load %arg8[%c0_34, %c0_35, %c0_36] : memref<1x1x128xf32, #tpu.memory_space<vmem>>, vector<1x1x128xf32>
    %100 = vector.shape_cast %99 : vector<1x1x128xf32> to vector<1x128xf32>
    %101 = vector.broadcast %100 : vector<1x128xf32> to vector<16x128xf32>
    %102 = arith.addf %98, %101 : vector<16x128xf32>
    %103 = arith.addf %102, %3 : vector<16x128xf32>
    %c0_37 = arith.constant 0 : index
    %c0_38 = arith.constant 0 : index
    %c0_39 = arith.constant 0 : index
    %104 = vector.load %arg9[%c0_37, %c0_38, %c0_39] : memref<1x1x128xf32, #tpu.memory_space<vmem>>, vector<1x1x128xf32>
    %105 = vector.shape_cast %104 : vector<1x1x128xf32> to vector<1x128xf32>
    %c0_40 = arith.constant 0 : index
    %c0_41 = arith.constant 0 : index
    %c0_42 = arith.constant 0 : index
    %106 = vector.load %arg10[%c0_40, %c0_41, %c0_42] : memref<1x1x128xf32, #tpu.memory_space<vmem>>, vector<1x1x128xf32>
    %107 = vector.shape_cast %106 : vector<1x1x128xf32> to vector<1x128xf32>
    %cst_43 = arith.constant dense<0.000000e+00> : vector<16xf32>
    %108 = vector.multi_reduction <add>, %103, %cst_43 [1] : vector<16x128xf32> to vector<16xf32>
    %109 = vector.shape_cast %108 : vector<16xf32> to vector<16x1xf32>
    %cst_44 = arith.constant 1.280000e+02 : f32
    %110 = vector.broadcast %cst_44 : f32 to vector<16x1xf32>
    %111 = arith.divf %109, %110 : vector<16x1xf32>
    %112 = vector.broadcast %111 : vector<16x1xf32> to vector<16x128xf32>
    %113 = arith.subf %103, %112 : vector<16x128xf32>
    %114 = arith.mulf %113, %113 : vector<16x128xf32>
    %cst_45 = arith.constant dense<0.000000e+00> : vector<16xf32>
    %115 = vector.multi_reduction <add>, %114, %cst_45 [1] : vector<16x128xf32> to vector<16xf32>
    %116 = vector.shape_cast %115 : vector<16xf32> to vector<16x1xf32>
    %cst_46 = arith.constant 1.280000e+02 : f32
    %117 = vector.broadcast %cst_46 : f32 to vector<16x1xf32>
    %118 = arith.divf %116, %117 : vector<16x1xf32>
    %cst_47 = arith.constant 9.99999974E-6 : f32
    %119 = vector.broadcast %cst_47 : f32 to vector<16x1xf32>
    %120 = arith.addf %118, %119 : vector<16x1xf32>
    %121 = math.rsqrt %120 : vector<16x1xf32>
    %122 = vector.broadcast %121 : vector<16x1xf32> to vector<16x128xf32>
    %123 = arith.mulf %113, %122 : vector<16x128xf32>
    %124 = vector.broadcast %105 : vector<1x128xf32> to vector<16x128xf32>
    %125 = arith.mulf %123, %124 : vector<16x128xf32>
    %126 = vector.broadcast %107 : vector<1x128xf32> to vector<16x128xf32>
    %127 = arith.addf %125, %126 : vector<16x128xf32>
    %c0_48 = arith.constant 0 : index
    %c0_49 = arith.constant 0 : index
    %c0_50 = arith.constant 0 : index
    %128 = vector.load %arg11[%c0_48, %c0_49, %c0_50] : memref<1x128x256xf32, #tpu.memory_space<vmem>>, vector<1x128x256xf32>
    %129 = vector.shape_cast %128 : vector<1x128x256xf32> to vector<128x256xf32>
    %cst_51 = arith.constant dense<0.000000e+00> : vector<16x256xf32>
    %130 = tpu.matmul %127, %129, %cst_51 {dimension_numbers = #tpu.dot_dimension_numbers<[1], [0], [0], [1], [0, 0, 1, 1], [], []>} : vector<16x128xf32>, vector<128x256xf32>, vector<16x256xf32> -> vector<16x256xf32>
    %c0_52 = arith.constant 0 : index
    %c0_53 = arith.constant 0 : index
    %c0_54 = arith.constant 0 : index
    %131 = vector.load %arg12[%c0_52, %c0_53, %c0_54] : memref<1x1x256xf32, #tpu.memory_space<vmem>>, vector<1x1x256xf32>
    %132 = vector.shape_cast %131 : vector<1x1x256xf32> to vector<1x256xf32>
    %133 = vector.broadcast %132 : vector<1x256xf32> to vector<16x256xf32>
    %134 = arith.addf %130, %133 : vector<16x256xf32>
    %cst_55 = arith.constant 5.000000e-01 : f32
    %135 = vector.broadcast %cst_55 : f32 to vector<16x256xf32>
    %136 = arith.mulf %135, %134 : vector<16x256xf32>
    %cst_56 = arith.constant 4.471500e-02 : f32
    %137 = vector.broadcast %cst_56 : f32 to vector<16x256xf32>
    %138 = arith.mulf %137, %134 : vector<16x256xf32>
    %139 = arith.mulf %138, %134 : vector<16x256xf32>
    %140 = arith.mulf %139, %134 : vector<16x256xf32>
    %141 = arith.addf %134, %140 : vector<16x256xf32>
    %cst_57 = arith.constant 0.797884583 : f32
    %142 = vector.broadcast %cst_57 : f32 to vector<16x256xf32>
    %143 = arith.mulf %142, %141 : vector<16x256xf32>
    %144 = math.tanh %143 : vector<16x256xf32>
    %cst_58 = arith.constant 1.000000e+00 : f32
    %145 = vector.broadcast %cst_58 : f32 to vector<16x256xf32>
    %146 = arith.addf %145, %144 : vector<16x256xf32>
    %147 = arith.mulf %136, %146 : vector<16x256xf32>
    %c0_59 = arith.constant 0 : index
    %c0_60 = arith.constant 0 : index
    %c0_61 = arith.constant 0 : index
    %148 = vector.load %arg13[%c0_59, %c0_60, %c0_61] : memref<1x256x128xf32, #tpu.memory_space<vmem>>, vector<1x256x128xf32>
    %149 = vector.shape_cast %148 : vector<1x256x128xf32> to vector<256x128xf32>
    %cst_62 = arith.constant dense<0.000000e+00> : vector<16x128xf32>
    %150 = tpu.matmul %147, %149, %cst_62 {dimension_numbers = #tpu.dot_dimension_numbers<[1], [0], [0], [1], [0, 0, 1, 1], [], []>} : vector<16x256xf32>, vector<256x128xf32>, vector<16x128xf32> -> vector<16x128xf32>
    %c0_63 = arith.constant 0 : index
    %c0_64 = arith.constant 0 : index
    %c0_65 = arith.constant 0 : index
    %151 = vector.load %arg14[%c0_63, %c0_64, %c0_65] : memref<1x1x128xf32, #tpu.memory_space<vmem>>, vector<1x1x128xf32>
    %152 = vector.shape_cast %151 : vector<1x1x128xf32> to vector<1x128xf32>
    %153 = vector.broadcast %152 : vector<1x128xf32> to vector<16x128xf32>
    %154 = arith.addf %150, %153 : vector<16x128xf32>
    %155 = arith.addf %154, %127 : vector<16x128xf32>
    %c0_66 = arith.constant 0 : index
    %c0_67 = arith.constant 0 : index
    %c0_68 = arith.constant 0 : index
    %156 = vector.load %arg15[%c0_66, %c0_67, %c0_68] : memref<1x1x128xf32, #tpu.memory_space<vmem>>, vector<1x1x128xf32>
    %157 = vector.shape_cast %156 : vector<1x1x128xf32> to vector<1x128xf32>
    %c0_69 = arith.constant 0 : index
    %c0_70 = arith.constant 0 : index
    %c0_71 = arith.constant 0 : index
    %158 = vector.load %arg16[%c0_69, %c0_70, %c0_71] : memref<1x1x128xf32, #tpu.memory_space<vmem>>, vector<1x1x128xf32>
    %159 = vector.shape_cast %158 : vector<1x1x128xf32> to vector<1x128xf32>
    %cst_72 = arith.constant dense<0.000000e+00> : vector<16xf32>
    %160 = vector.multi_reduction <add>, %155, %cst_72 [1] : vector<16x128xf32> to vector<16xf32>
    %161 = vector.shape_cast %160 : vector<16xf32> to vector<16x1xf32>
    %cst_73 = arith.constant 1.280000e+02 : f32
    %162 = vector.broadcast %cst_73 : f32 to vector<16x1xf32>
    %163 = arith.divf %161, %162 : vector<16x1xf32>
    %164 = vector.broadcast %163 : vector<16x1xf32> to vector<16x128xf32>
    %165 = arith.subf %155, %164 : vector<16x128xf32>
    %166 = arith.mulf %165, %165 : vector<16x128xf32>
    %cst_74 = arith.constant dense<0.000000e+00> : vector<16xf32>
    %167 = vector.multi_reduction <add>, %166, %cst_74 [1] : vector<16x128xf32> to vector<16xf32>
    %168 = vector.shape_cast %167 : vector<16xf32> to vector<16x1xf32>
    %cst_75 = arith.constant 1.280000e+02 : f32
    %169 = vector.broadcast %cst_75 : f32 to vector<16x1xf32>
    %170 = arith.divf %168, %169 : vector<16x1xf32>
    %cst_76 = arith.constant 9.99999974E-6 : f32
    %171 = vector.broadcast %cst_76 : f32 to vector<16x1xf32>
    %172 = arith.addf %170, %171 : vector<16x1xf32>
    %173 = math.rsqrt %172 : vector<16x1xf32>
    %174 = vector.broadcast %173 : vector<16x1xf32> to vector<16x128xf32>
    %175 = arith.mulf %165, %174 : vector<16x128xf32>
    %176 = vector.broadcast %157 : vector<1x128xf32> to vector<16x128xf32>
    %177 = arith.mulf %175, %176 : vector<16x128xf32>
    %178 = vector.broadcast %159 : vector<1x128xf32> to vector<16x128xf32>
    %179 = arith.addf %177, %178 : vector<16x128xf32>
    %c0_77 = arith.constant 0 : index
    %c0_78 = arith.constant 0 : index
    %180 = vector.load %arg22[%c0_77, %c0_78] : memref<16x128xf32, #tpu.memory_space<vmem>>, vector<16x128xf32>
    tpu.vector_store %arg22[%c0_77, %c0_78], %179 {strides = array<i32>} : memref<16x128xf32, #tpu.memory_space<vmem>>, vector<16x128xf32>,
    %c1_i32 = arith.constant 1 : i32
    %181 = arith.cmpi eq, %arg0, %c1_i32 : i32
    %182 = arith.extui %181 : i1 to i32
    %c0_i32_79 = arith.constant 0 : i32
    %183 = arith.cmpi ne, %182, %c0_i32_79 : i32
    scf.if %183 {
      %184 = vector.extract_strided_slice %179 {offsets = [0, 0], sizes = [1, 128], strides = [1, 1]} : vector<16x128xf32> to vector<1x128xf32>
      %185 = vector.extract_strided_slice %179 {offsets = [8, 0], sizes = [1, 128], strides = [1, 1]} : vector<16x128xf32> to vector<1x128xf32>
      %186 = tpu.concatenate %184, %185 in 0 : vector<1x128xf32>, vector<1x128xf32> -> vector<2x128xf32>
      %c0_80 = arith.constant 0 : index
      %c0_81 = arith.constant 0 : index
      %187 = vector.load %arg17[%c0_80, %c0_81] : memref<128x128xf32, #tpu.memory_space<vmem>>, vector<128x128xf32>
      %cst_82 = arith.constant dense<0.000000e+00> : vector<2x128xf32>
      %188 = tpu.matmul %186, %187, %cst_82 {dimension_numbers = #tpu.dot_dimension_numbers<[1], [0], [0], [1], [0, 0, 1, 1], [], []>} : vector<2x128xf32>, vector<128x128xf32>, vector<2x128xf32> -> vector<2x128xf32>
      %c0_83 = arith.constant 0 : index
      %c0_84 = arith.constant 0 : index
      %189 = vector.load %arg18[%c0_83, %c0_84] : memref<1x128xf32, #tpu.memory_space<vmem>>, vector<1x128xf32>
      %190 = vector.broadcast %189 : vector<1x128xf32> to vector<2x128xf32>
      %191 = arith.addf %188, %190 : vector<2x128xf32>
      %cst_85 = arith.constant 0.000000e+00 : f32
      %192 = vector.broadcast %cst_85 : f32 to vector<2x128xf32>
      %193 = arith.maximumf %191, %192 : vector<2x128xf32>
      %c0_86 = arith.constant 0 : index
      %c0_87 = arith.constant 0 : index
      %194 = vector.load %arg19[%c0_86, %c0_87] : memref<128x2xf32, #tpu.memory_space<vmem>>, vector<128x2xf32>
      %cst_88 = arith.constant dense<0.000000e+00> : vector<2x2xf32>
      %195 = tpu.matmul %193, %194, %cst_88 {dimension_numbers = #tpu.dot_dimension_numbers<[1], [0], [0], [1], [0, 0, 1, 1], [], []>} : vector<2x128xf32>, vector<128x2xf32>, vector<2x2xf32> -> vector<2x2xf32>
      %c0_89 = arith.constant 0 : index
      %c0_90 = arith.constant 0 : index
      %196 = vector.load %arg20[%c0_89, %c0_90] : memref<1x2xf32, #tpu.memory_space<vmem>>, vector<1x2xf32>
      %197 = vector.broadcast %196 : vector<1x2xf32> to vector<2x2xf32>
      %198 = arith.addf %195, %197 : vector<2x2xf32>
      %cst_91 = arith.constant dense<0xFF800000> : vector<2xf32>
      %199 = vector.multi_reduction <maximumf>, %198, %cst_91 [1] : vector<2x2xf32> to vector<2xf32>
      %200 = vector.shape_cast %199 : vector<2xf32> to vector<2x1xf32>
      %201 = vector.broadcast %200 : vector<2x1xf32> to vector<2x2xf32>
      %202 = arith.subf %198, %201 : vector<2x2xf32>
      %203 = math.exp %202 : vector<2x2xf32>
      %cst_92 = arith.constant dense<0.000000e+00> : vector<2xf32>
      %204 = vector.multi_reduction <add>, %203, %cst_92 [1] : vector<2x2xf32> to vector<2xf32>
      %205 = vector.shape_cast %204 : vector<2xf32> to vector<2x1xf32>
      %206 = vector.broadcast %205 : vector<2x1xf32> to vector<2x2xf32>
      %207 = arith.divf %203, %206 : vector<2x2xf32>
      %c0_93 = arith.constant 0 : index
      %c0_94 = arith.constant 0 : index
      %208 = vector.load %arg21[%c0_93, %c0_94] : memref<2x2xf32, #tpu.memory_space<vmem>>, vector<2x2xf32>
      tpu.vector_store %arg21[%c0_93, %c0_94], %207 {strides = array<i32>} : memref<2x2xf32, #tpu.memory_space<vmem>>, vector<2x2xf32>,
    } else {
    }
    return
  }
  func.func @transform_0(%arg0: i32) -> (i32, i32) {
    %c0_i32 = arith.constant 0 : i32
    %c0_i32_0 = arith.constant 0 : i32
    %c0_i32_1 = arith.constant 0 : i32
    return %c0_i32, %c0_i32_0 : i32, i32
  }
  func.func @transform_1(%arg0: i32) -> (i32, i32) {
    %c0_i32 = arith.constant 0 : i32
    %c0_i32_0 = arith.constant 0 : i32
    %c0_i32_1 = arith.constant 0 : i32
    return %c0_i32, %c0_i32_0 : i32, i32
  }
  func.func @transform_2(%arg0: i32) -> (i32, i32) {
    %c0_i32 = arith.constant 0 : i32
    %c0_i32_0 = arith.constant 0 : i32
    %c0_i32_1 = arith.constant 0 : i32
    return %c0_i32, %c0_i32_0 : i32, i32
  }
  func.func @transform_3(%arg0: i32) -> (i32, i32) {
    %c0_i32 = arith.constant 0 : i32
    %c0_i32_0 = arith.constant 0 : i32
    %c0_i32_1 = arith.constant 0 : i32
    return %c0_i32, %c0_i32_0 : i32, i32
  }
  func.func @transform_4(%arg0: i32) -> (i32, i32, i32) {
    %c0_i32 = arith.constant 0 : i32
    %c0_i32_0 = arith.constant 0 : i32
    %c0_i32_1 = arith.constant 0 : i32
    return %arg0, %c0_i32, %c0_i32_0 : i32, i32, i32
  }
  func.func @transform_5(%arg0: i32) -> (i32, i32, i32) {
    %c0_i32 = arith.constant 0 : i32
    %c0_i32_0 = arith.constant 0 : i32
    %c0_i32_1 = arith.constant 0 : i32
    return %arg0, %c0_i32, %c0_i32_0 : i32, i32, i32
  }
  func.func @transform_6(%arg0: i32) -> (i32, i32, i32) {
    %c0_i32 = arith.constant 0 : i32
    %c0_i32_0 = arith.constant 0 : i32
    %c0_i32_1 = arith.constant 0 : i32
    return %arg0, %c0_i32, %c0_i32_0 : i32, i32, i32
  }
  func.func @transform_7(%arg0: i32) -> (i32, i32, i32) {
    %c0_i32 = arith.constant 0 : i32
    %c0_i32_0 = arith.constant 0 : i32
    %c0_i32_1 = arith.constant 0 : i32
    return %arg0, %c0_i32, %c0_i32_0 : i32, i32, i32
  }
  func.func @transform_8(%arg0: i32) -> (i32, i32, i32) {
    %c0_i32 = arith.constant 0 : i32
    %c0_i32_0 = arith.constant 0 : i32
    %c0_i32_1 = arith.constant 0 : i32
    return %arg0, %c0_i32, %c0_i32_0 : i32, i32, i32
  }
  func.func @transform_9(%arg0: i32) -> (i32, i32, i32) {
    %c0_i32 = arith.constant 0 : i32
    %c0_i32_0 = arith.constant 0 : i32
    %c0_i32_1 = arith.constant 0 : i32
    return %arg0, %c0_i32, %c0_i32_0 : i32, i32, i32
  }
  func.func @transform_10(%arg0: i32) -> (i32, i32, i32) {
    %c0_i32 = arith.constant 0 : i32
    %c0_i32_0 = arith.constant 0 : i32
    %c0_i32_1 = arith.constant 0 : i32
    return %arg0, %c0_i32, %c0_i32_0 : i32, i32, i32
  }
  func.func @transform_11(%arg0: i32) -> (i32, i32, i32) {
    %c0_i32 = arith.constant 0 : i32
    %c0_i32_0 = arith.constant 0 : i32
    %c0_i32_1 = arith.constant 0 : i32
    return %arg0, %c0_i32, %c0_i32_0 : i32, i32, i32
  }
  func.func @transform_12(%arg0: i32) -> (i32, i32, i32) {
    %c0_i32 = arith.constant 0 : i32
    %c0_i32_0 = arith.constant 0 : i32
    %c0_i32_1 = arith.constant 0 : i32
    return %arg0, %c0_i32, %c0_i32_0 : i32, i32, i32
  }
  func.func @transform_13(%arg0: i32) -> (i32, i32, i32) {
    %c0_i32 = arith.constant 0 : i32
    %c0_i32_0 = arith.constant 0 : i32
    %c0_i32_1 = arith.constant 0 : i32
    return %arg0, %c0_i32, %c0_i32_0 : i32, i32, i32
  }
  func.func @transform_14(%arg0: i32) -> (i32, i32, i32) {
    %c0_i32 = arith.constant 0 : i32
    %c0_i32_0 = arith.constant 0 : i32
    %c0_i32_1 = arith.constant 0 : i32
    return %arg0, %c0_i32, %c0_i32_0 : i32, i32, i32
  }
  func.func @transform_15(%arg0: i32) -> (i32, i32, i32) {
    %c0_i32 = arith.constant 0 : i32
    %c0_i32_0 = arith.constant 0 : i32
    %c0_i32_1 = arith.constant 0 : i32
    return %arg0, %c0_i32, %c0_i32_0 : i32, i32, i32
  }
  func.func @transform_16(%arg0: i32) -> (i32, i32) {
    %c0_i32 = arith.constant 0 : i32
    %c0_i32_0 = arith.constant 0 : i32
    %c0_i32_1 = arith.constant 0 : i32
    return %c0_i32, %c0_i32_0 : i32, i32
  }
  func.func @transform_17(%arg0: i32) -> (i32, i32) {
    %c0_i32 = arith.constant 0 : i32
    %c0_i32_0 = arith.constant 0 : i32
    %c0_i32_1 = arith.constant 0 : i32
    return %c0_i32, %c0_i32_0 : i32, i32
  }
  func.func @transform_18(%arg0: i32) -> (i32, i32) {
    %c0_i32 = arith.constant 0 : i32
    %c0_i32_0 = arith.constant 0 : i32
    %c0_i32_1 = arith.constant 0 : i32
    return %c0_i32, %c0_i32_0 : i32, i32
  }
  func.func @transform_19(%arg0: i32) -> (i32, i32) {
    %c0_i32 = arith.constant 0 : i32
    %c0_i32_0 = arith.constant 0 : i32
    %c0_i32_1 = arith.constant 0 : i32
    return %c0_i32, %c0_i32_0 : i32, i32
  }
  func.func @transform_20(%arg0: i32) -> (i32, i32) {
    %c0_i32 = arith.constant 0 : i32
    %c0_i32_0 = arith.constant 0 : i32
    %c0_i32_1 = arith.constant 0 : i32
    return %c0_i32, %c0_i32_0 : i32, i32
  }
}

</mosaic_0001>

<bundles_post_ra>
// kernel: roberta_class_forward.1
= control target key start
LH: loop header
LB: loop body
LE: loop exit
PB: predicated region body
PF: predicated region fallthrough
CT: control target
= control target key end

     0   :  { %s4314_s0 = inlined_call_operand.vmem [shape: f32[16,128], index: 0, kind: input, shape index: {}]   ;;  %s4315_s1 = inlined_call_operand.vmem [shape: f32[1,128], index: 1, kind: input, shape index: {}]   ;;  %s4316_s2 = inlined_call_operand.vmem [shape: f32[1,128], index: 2, kind: input, shape index: {}]   ;;  %s4317_s3 = inlined_call_operand.vmem [shape: f32[2,8], index: 3, kind: input, shape index: {}]   ;;  %s4318_s4 = inlined_call_operand.hbm [shape: f32[2,128,384], index: 4, kind: input, shape index: {}]   ;;  %s4319_s5 = inlined_call_operand.vmem [shape: f32[2,1,384], index: 5, kind: input, shape index: {}]   ;;  %s4320_s6 = inlined_call_operand.vmem [shape: f32[2,128,128], index: 6, kind: input, shape index: {}]   ;;  %s4321_s7 = inlined_call_operand.vmem [shape: f32[2,1,128], index: 7, kind: input, shape index: {}]   ;;  %s4322_s8 = inlined_call_operand.vmem [shape: f32[2,1,128], index: 8, kind: input, shape index: {}]   ;;  %s4323_s9 = inlined_call_operand.vmem [shape: f32[2,1,128], index: 9, kind: input, shape index: {}]   ;;  %s4324_s10 = inlined_call_operand.hbm [shape: f32[2,128,256], index: 10, kind: input, shape index: {}]   ;;  %s4325_s11 = inlined_call_operand.vmem [shape: f32[2,1,256], index: 11, kind: input, shape index: {}]   ;;  %s4326_s12 = inlined_call_operand.hbm [shape: f32[2,256,128], index: 12, kind: input, shape index: {}]   ;;  %s4327_s13 = inlined_call_operand.vmem [shape: f32[2,1,128], index: 13, kind: input, shape index: {}]   ;;  %s4328_s14 = inlined_call_operand.vmem [shape: f32[2,1,128], index: 14, kind: input, shape index: {}]   ;;  %s4329_s15 = inlined_call_operand.vmem [shape: f32[2,1,128], index: 15, kind: input, shape index: {}]   ;;  %s4330_s16 = inlined_call_operand.vmem [shape: f32[128,128], index: 16, kind: input, shape index: {}]   ;;  %s4331_s17 = inlined_call_operand.vmem [shape: f32[1,128], index: 17, kind: input, shape index: {}]   ;;  %s4332_s18 = inlined_call_operand.vmem [shape: f32[128,2], index: 18, kind: input, shape index: {}]   ;;  %s4333_s19 = inlined_call_operand.vmem [shape: f32[1,2], index: 19, kind: input, shape index: {}]   ;;  %s4334_s20 = inlined_call_operand.hbm [shape: f32[2,2], index: 20, kind: output, shape index: {}]  }
   0x1   :  { %4347 = sst [smem:[#allocation16_spill]] %s4314_s0 }
   0x2   :  { %4348 = sst [smem:[#allocation17_spill]] %s4315_s1 }
   0x3   :  { %4349 = sst [smem:[#allocation18_spill]] %s4316_s2 }
   0x4   :  { %4350 = sst [smem:[#allocation19_spill]] %s4317_s3 }
   0x5   :  { %4351 = sst [smem:[#allocation20_spill]] %s4318_s4 }
   0x6   :  { %4352 = sst [smem:[#allocation21_spill]] %s4319_s5 }
   0x7   :  { %4353 = sst [smem:[#allocation22_spill]] %s4320_s6 }
   0x8   :  { %4354 = sst [smem:[#allocation23_spill]] %s4324_s10 }
   0x9   :  { %4355 = sst [smem:[#allocation24_spill]] %s4326_s12 }
   0xa   :  { %4356 = sst [smem:[#allocation25_spill]] %s4329_s15 }
   0xb   :  { %4357 = sst [smem:[#allocation26_spill]] %s4330_s16 }
   0xc   :  { %4358 = sst [smem:[#allocation27_spill]] %s4331_s17 }
   0xd   :  { %4359 = sst [smem:[#allocation28_spill]] %s4332_s18 }
   0xe   :  { %4360 = sst [smem:[#allocation29_spill]] %s4333_s19 }
   0xf   :  { %4361 = sst [smem:[#allocation30_spill]] %s4334_s20 }
  0x10   :  { %25 = vsyncpa [#allocation4], 0 }
  0x11   :  { %27 = vsyncpa [#allocation4 + $0x1], 0 }
  0x12   :  { %28 = vsyncpa [#allocation7], 0 }
  0x13   :  { %30 = vsyncpa [#allocation7 + $0x1], 0 }
  0x14   :  { %31 = vsyncpa [#allocation5], 0  ;;  %s3612_s1 = smov 0   ;;  %s3614_s22 = smov 0  }
  0x15   :  { %s3616_s23 = smov 0   ;;  %s3618_s24 = smov 0  }
  0x16 LB: > { %4362 = sst [smem:[#allocation13_spill]] %s3485_s23  ;;  %s3631_s2 = sadd.s32 4294967295, %s3489_s24   ;;  %s3489_s24 = sphi %s3618_s24, %s4391_s24   ;;  %s3485_s23 = sphi %s3616_s23, %s4393_s23   ;;  %s3481_s22 = sphi %s3614_s22, %s4395_s22   ;;  %s3477_s1 = sphi %s3612_s1, %s4394_s1  }
  0x17   : > { %s3634_s25 = sadd.s32 1, %s3489_s24   ;;  %s128_s26 = sadd.s32 1, %s3485_s23 }
  0x18   : > { %4363 = sst [smem:[#allocation14_spill]] %s3634_s25  ;;  %s125_s3 = ssub.s32 %s3489_s24, %s3634_s25 }
  0x19   : > { %p126_p0 = scmp.eq.s32.totalorder %s125_s3, 0  ;;  %p135_p1 = scmp.ne.s32.totalorder %s3485_s23, %s3481_s22 }
  0x1a   : > { %p136_p2 = scmp.eq.s32.totalorder %s3489_s24, 0  ;;  %p141_p3 = scmp.ne.s32.totalorder %s3481_s22, %s3477_s1 }
  0x1b   : > { %s3644_s27 = scalar_select %p126_p0, %s3485_s23, %s128_s26  }
  0x1c   : > { %p137_p4 = por %p136_p2, %p135_p1  ;;  %p142_p5 = scmp.eq.s32.totalorder %s3631_s2, 0 }
  0x1d   : > { %4364 = sst [smem:[#allocation15_spill]] %s3644_s27  ;;  %p3238_p6 = scmp.lt.s32.totalorder %s3489_s24, 2 }
  0x1e   : > { %p3648_p7 = por %p142_p5, %p141_p3  ;;  %s3653_s4 = sand.u32 1, %s3485_s23  }
  0x1f   : > { %p3655_p8 = pnand %p3238_p6, %p137_p4  ;;  %s634_s30 = sand.u32 1, %s3489_s24  }
  0x20   : > { %s4365_s28 = scalar_select %p3648_p7, 1, 0 }
  0x21   : > { %s4341_s0 = sshll.u32 %s3653_s4, 8  ;;  %s4342_s21 = sshll.u32 %s3489_s24, 12 }
  0x22   : > { %s638_s1 = scalar_lea.vmem [#allocation6], %s4341_s0  ;;  %s4367_s10 = sld [smem:[#allocation23_spill]] }
  0x23   : > { %s645_s3 = sshll.u32 %s638_s1, 4  ;;  %s3673_s23 = scalar_lea.sflag [#allocation7], %s634_s30  ;;  %s3671_s3 = int_to_ptr.vmem [resolvable:$true] %s645_s3 }
  0x24   : > { %p3679_p10 = pneg %p3655_p8 }
  0x28   : > { %s3669_s25 = scalar_lea.hbm %s4367_s10, %s4342_s21  ;;  %s3336_s26 = scalar_lea.hbm %s4367_s10, 8192 }
  0x29   : > { %s3331_s20 = scalar_lea.hbm %s3669_s25, 4096  ;;  %p3337_p13 = scmp.lt.u32.totalorder %s3669_s25, %s4367_s10 }
  0x2a   : > { %p3332_p9 = scmp.ne.s32.totalorder %s3669_s25, %s3331_s20  ;;  %p3338_p0 = scmp.lt.u32.totalorder %s3336_s26, %s3331_s20 }
  0x2b   : > { %p3340_p2 = scmp.lt.u32.totalorder %s3331_s20, %s3669_s25 }
  0x2c   : > { %p3334_p11 = pnand %p3679_p10, %p3332_p9  ;;  %p3339_p1 = por %p3338_p0, %p3337_p13 }
  0x2e   : > { %p3335_p12 = pneg %p3334_p11  ;;  %p3341_p3 = por %p3340_p2, %p3339_p1 }
  0x30   : > { %p3342_p4 = pnand %p3341_p3, %p3335_p12 }
  0x32   : > { %3345 = shalt.err (!%p3342_p4)
}
  0x33   : > { %s3346_s30 = scalar_lea.vmem %s3671_s3, 4096  ;;  %s3491_s27 = smov [#allocation6]  }
  0x34   : > { %p3347_p5 = scmp.ne.s32.totalorder %s3671_s3, %s3346_s30  ;;  %s3351_s1 = sshll.u32 %s3491_s27, 4  ;;  %s3352_s1 = int_to_ptr.vmem [resolvable:$false] %s3351_s1 }
  0x35   : > { %s3353_s19 = scalar_lea.vmem %s3352_s1, 8192  ;;  %p3354_p11 = scmp.lt.s32.totalorder %s3671_s3, %s3352_s1 }
  0x36   : > { %p3349_p6 = pnand %p3347_p5, %p3679_p10  ;;  %p3355_p7 = scmp.lt.s32.totalorder %s3353_s19, %s3346_s30 }
  0x38   : > { %p3350_p9 = pneg %p3349_p6  ;;  %p3356_p13 = por %p3355_p7, %p3354_p11 }
  0x3a   : > { %p3357_p0 = pnand %p3356_p13, %p3350_p9 }
  0x3c   : > { %3360 = shalt.err (!%p3357_p0)
}
  0x3d   : > { %s3492_s20 = smov 256   ;;  %s3493_s21 = smov 16  }
  0x3e   : > { %3234 = dma.hbm_to_vmem [thread:$0]  (!%p3655_p8), %s3669_s25, 4096, %s3671_s3, %s3673_s23, %s3492_s20, %s3492_s20, %s3493_s21  }
  0x3f   : > { %s4369_s26 = sshll.u32 %s3489_s24, 12  ;;  %s4370_s12 = sld [smem:[#allocation24_spill]] }
  0x40   : > { %s4371_s19 = sshll.u32 %s3653_s4, 8  ;;  %p2665_p7 = scmp.ge.s32.totalorder %s3489_s24, 1 }
  0x41   : > { %s666_s10 = scalar_lea.vmem [#allocation8], %s4371_s19  ;;  %p699_p12 = scmp.lt.s32.totalorder %s3489_s24, 3 }
  0x42   : > { %s673_s17 = sshll.u32 %s666_s10, 4  ;;  %s3214_s18 = smul.u32 384, %s3653_s4  ;;  %s3713_s17 = int_to_ptr.vmem [resolvable:$true] %s673_s17 }
  0x43   : > { %p3717_p1 = pnand %p2665_p7, %p699_p12  ;;  %s3215_s25 = smul.u32 6144, %s3489_s24 }
  0x44   : > { %s4373_s21 = sld [smem:[#allocation20_spill]]  ;;  %s584_s10 = scalar_lea.vmem [#allocation3], %s3214_s18 }
  0x45   : > { %s3708_s1 = scalar_lea.hbm %s4370_s12, %s4369_s26  ;;  %s591_s26 = sshll.u32 %s584_s10, 4  ;;  %s3727_s26 = int_to_ptr.vmem [resolvable:$true] %s591_s26 }
  0x46   : > { %s4372_s16 = scalar_select %p3717_p1, 1, 0 }
  0x47   : > { %s581_s27 = scalar_lea.sflag [#allocation4], %s3653_s4 }
  0x4a   : > { %s3725_s30 = scalar_lea.hbm %s4373_s21, %s3215_s25  ;;  %s3366_s3 = scalar_lea.hbm %s4373_s21, 12288 }
  0x4b   : > { %s3361_s19 = scalar_lea.hbm %s3725_s30, 6144  ;;  %p3367_p5 = scmp.lt.u32.totalorder %s3725_s30, %s4373_s21 }
  0x4c   : > { %p3362_p2 = scmp.ne.s32.totalorder %s3725_s30, %s3361_s19  ;;  %p3368_p6 = scmp.lt.u32.totalorder %s3366_s3, %s3361_s19 }
  0x4d   : > { %p3370_p11 = scmp.lt.u32.totalorder %s3361_s19, %s3725_s30 }
  0x4e   : > { %p3364_p3 = pnand %p3362_p2, %p3679_p10  ;;  %p3369_p9 = por %p3368_p6, %p3367_p5 }
  0x50   : > { %p3365_p4 = pneg %p3364_p3  ;;  %p3371_p13 = por %p3370_p11, %p3369_p9 }
  0x52   : > { %p3372_p0 = pnand %p3371_p13, %p3365_p4 }
  0x54   : > { %3375 = shalt.err (!%p3372_p0)
}
  0x55   : > { %s3376_s18 = scalar_lea.vmem %s3727_s26, 6144  ;;  %s3494_s15 = smov [#allocation3]  }
  0x56   : > { %p3377_p7 = scmp.ne.s32.totalorder %s3727_s26, %s3376_s18  ;;  %s3381_s10 = sshll.u32 %s3494_s15, 4  ;;  %s3382_s10 = int_to_ptr.vmem [resolvable:$false] %s3381_s10 }
  0x57   : > { %s3383_s24 = scalar_lea.vmem %s3382_s10, 12288  ;;  %p3384_p3 = scmp.lt.s32.totalorder %s3727_s26, %s3382_s10 }
  0x58   : > { %p3379_p12 = pnand %p3377_p7, %p3679_p10  ;;  %p3385_p1 = scmp.lt.s32.totalorder %s3383_s24, %s3376_s18 }
  0x5a   : > { %p3380_p2 = pneg %p3379_p12  ;;  %p3386_p5 = por %p3385_p1, %p3384_p3 }
  0x5c   : > { %p3387_p6 = pnand %p3386_p5, %p3380_p2 }
  0x5e   : > { %3390 = shalt.err (!%p3387_p6)
}
  0x5f   : > { %s3495_s19 = smov 384   ;;  %s3496_s3 = smov 24  }
  0x60   : > { %3231 = dma.hbm_to_vmem [thread:$0]  (!%p3655_p8), %s3725_s30, 6144, %s3727_s26, %s581_s27, %s3495_s19, %s3495_s19, %s3496_s3  }
  0x61   : > { %s3391_s25 = scalar_lea.hbm %s3708_s1, 4096  ;;  %s3396_s15 = scalar_lea.hbm %s4370_s12, 8192 }
  0x62   : > { %p3392_p4 = scmp.ne.s32.totalorder %s3708_s1, %s3391_s25  ;;  %p3397_p11 = scmp.lt.u32.totalorder %s3708_s1, %s4370_s12 }
  0x63   : > { %p3398_p13 = scmp.lt.u32.totalorder %s3396_s15, %s3391_s25  ;;  %p3400_p7 = scmp.lt.u32.totalorder %s3391_s25, %s3708_s1 }
  0x64   : > { %p3394_p1 = pnand %p3392_p4, %p3679_p10 }
  0x65   : > { %p3399_p0 = por %p3398_p13, %p3397_p11 }
  0x66   : > { %p3395_p9 = pneg %p3394_p1 }
  0x67   : > { %p3401_p12 = por %p3400_p7, %p3399_p0 }
  0x69   : > { %p3402_p2 = pnand %p3401_p12, %p3395_p9 }
  0x6b   : > { %3405 = shalt.err (!%p3402_p2)
}
  0x6c   : > { %s3406_s4 = scalar_lea.vmem %s3713_s17, 4096  ;;  %s3497_s30 = smov [#allocation8]  }
  0x6d   : > { %p3407_p3 = scmp.ne.s32.totalorder %s3713_s17, %s3406_s4  ;;  %s3411_s26 = sshll.u32 %s3497_s30, 4  ;;  %s3412_s26 = int_to_ptr.vmem [resolvable:$false] %s3411_s26 }
  0x6e   : > { %s3413_s27 = scalar_lea.vmem %s3412_s26, 8192  ;;  %p3414_p4 = scmp.lt.s32.totalorder %s3713_s17, %s3412_s26 }
  0x6f   : > { %p3409_p5 = pnand %p3407_p3, %p3679_p10  ;;  %p3415_p1 = scmp.lt.s32.totalorder %s3413_s27, %s3406_s4 }
  0x71   : > { %p3410_p6 = pneg %p3409_p5  ;;  %p3416_p11 = por %p3415_p1, %p3414_p4 }
  0x73   : > { %p3417_p13 = pnand %p3416_p11, %p3410_p6 }
  0x75   : > { %3420 = shalt.err (!%p3417_p13)
}
  0x76   : > { %s3498_s19 = smov 128   ;;  %s3499_s3 = smov 8  }
  0x77   : > { %3237 = dma.hbm_to_vmem [thread:$0]  (!%p3655_p8), %s3708_s1, 4096, %s3713_s17, %s3673_s23, %s3498_s19, %s3498_s19, %s3499_s3  }
  0x78   : > { %p4374_p10 = scmp.ne.s32.totalorder %s4372_s16, 0 }
  0x79   : > { %s705_s0 = sand.u32 (!%p4374_p10), 1, %s3481_s22   ;;  %p4375_p9 = scmp.ne.s32.totalorder (!%p4374_p10), %s4365_s28, 0 }
  0x7a   : > { %703 = sbr.rel (%p4374_p10) target bundleno = 4735 (0x127f), region = 100  ;;  %s706_s20 = scalar_lea.sflag (!%p4374_p10), [#allocation4], %s705_s0 }
  0x7b   : > { %s3216_s25 = smul.u32 (!%p4374_p10), 384, %s705_s0 }
  0x7d   : > { %s3778_s18 = scalar_lea.vmem (!%p4374_p10), [#allocation3], %s3216_s25 }
  0x81   : > { %3464 = dma.done.wait (%p4375_p9), %s706_s20, 6144  }
  0x82   : > { %3466 = vsyncadd (%p4375_p9), %s706_s20, 4294961152  ;;  %s714_s15 = sand.u32 1, %s3631_s2   ;;  %s2666_s29 = sshll.u32 %s705_s0, 8 }
  0x83   : > { %s715_s17 = scalar_lea.sflag [#allocation7], %s714_s15  ;;  %s3785_s23 = scalar_lea.vmem [#allocation6], %s2666_s29 }
  0x84   : > { %3468 = dma.done.wait (%p4375_p9), %s715_s17, 8192  }
  0x85   : > { %3470 = vsyncadd (%p4375_p9), %s715_s17, 4294959104  ;;  %p820_p8 = scmp.lt.s32.totalorder %s3631_s2, 1  ;;  %s4376_s6 = sld [smem:[#allocation22_spill]] }
  0x86   : > { %s4377_s5 = sld [smem:[#allocation21_spill]]  ;;  %s4378_s15 = sld [smem:[#allocation25_spill]] }
  0x87   : > { %s3793_s16 = scalar_select %p820_p8, %s3631_s2, 1 }
  0x88   : > { %s3837_s12 = scalar_lea.vmem [#allocation8], %s2666_s29  ;;  %p2671_p0 = scmp.ne.s32.totalorder %s3631_s2, 0 }
  0x89   : > { %s3217_s1 = smul.u32 3, %s3793_s16  ;;  %s2701_s10 = sshll.u32 %s3793_s16, 7 }
  0x8a   : > { %s837_s21 = scalar_lea.vmem %s4323_s9, %s3793_s16  ;;  %s2670_s24 = sshll.u32 %s3793_s16, 1 }
  0x8b   : > { %s3800_s28 = scalar_lea.vmem %s4376_s6, %s2701_s10  ;;  %s3823_s6 = scalar_lea.vmem %s4325_s11, %s2670_s24 }
  0x8c   : > { %s3809_s0 = scalar_lea.vmem %s4377_s5, %s3217_s1  ;;  %s844_s19 = scalar_lea.vmem %s4327_s13, %s3793_s16 }
  0x8d   : > { %s847_s27 = scalar_lea.vmem %s4328_s14, %s3793_s16  ;;  %s850_s5 = scalar_lea.vmem %s4378_s15, %s3793_s16 }
  0x8e   : > { %854 = sbr.rel (%p2671_p0) target bundleno = 465 (0x1d1), region = 116  ;;  %s4379_s10 = sld [smem:[#allocation16_spill]] (!%p2671_p0) }
  0x8f   : > { %s4380_s26 = sld [smem:[#allocation17_spill]] (!%p2671_p0)  ;;  %s4381_s25 = sld [smem:[#allocation18_spill]] (!%p2671_p0) }
  0x94   : > { %v855_v0 = vld [vmem:[%s4379_s10] sm:$0xff] (!%p2671_p0)  ;;  %v856_v1 = vld [vmem:[%s4379_s10 + $0x8] sm:$0xff] (!%p2671_p0) }
  0x95   : > { %859 = vadd.xlane.f32.xlu0 %v855_v0  ;;  %v2672_v17 = vld [vmem:[%s4380_s26] ss:$0 sm:$0xff] }
  0x96   : > { %v2673_v19 = vld [vmem:[%s4381_s25] ss:$0 sm:$0xff] }
  0x99   : > { %861 = vadd.xlane.f32.xlu0 %v856_v1 }
 0x122   : > { %v860_v2 = vpop.xlane.xlu0 %859 }
 0x123   : > { %v864_v3 = vmul.f32 0.0078125, %v860_v2 }
 0x125   : > { %v866_v4 = vsub.f32 %v855_v0, %v864_v3 }
 0x126   : > { %v862_v5 = vpop.xlane.xlu0 %861 }
 0x127   : > { %v865_v6 = vmul.f32 0.0078125, %v862_v5  ;;  %v868_v7 = vmul.f32 %v866_v4, %v866_v4 }
 0x129   : > { %v867_v8 = vsub.f32 %v856_v1, %v865_v6  ;;  %870 = vadd.xlane.f32.xlu1 %v868_v7 }
 0x12b   : > { %v869_v9 = vmul.f32 %v867_v8, %v867_v8 }
 0x12d   : > { %872 = vadd.xlane.f32.xlu1 %v869_v9 }
 0x1b6   : > { %v871_v10 = vpop.xlane.xlu1 %870 }
 0x1b7   : > { %v874_v11 = vmul.f32 0.0078125, %v871_v10 }
 0x1b9   : > { %v876_v12 = vadd.f32 1e-05, %v874_v11 }
 0x1ba   : > { %v873_v13 = vpop.xlane.xlu1 %872 }
 0x1bb   : > { %3286 = vrsqrt.f32 %v876_v12  ;;  %v875_v14 = vmul.f32 0.0078125, %v873_v13 }
 0x1bd   : > { %v877_v15 = vadd.f32 1e-05, %v875_v14 }
 0x1bf   : > { %3288 = vrsqrt.f32 %v877_v15 }
 0x1c5   : > { %v3287_v16 = vpop.eup %3286 }
 0x1c6   : > { %v880_v18 = vmul.f32 %v3287_v16, %v866_v4 }
 0x1c8   : > { %v888_v20 = vmul.f32 %v2672_v17, %v880_v18 }
 0x1c9   : > { %v3289_v21 = vpop.eup %3288 }
 0x1ca   : > { %v896_v22 = vadd.f32 %v2673_v19, %v888_v20  ;;  %v881_v23 = vmul.f32 %v3289_v21, %v867_v8 }
 0x1cc   : > { %898 = vst [vmem:[#allocation2] sm:$0xff] %v896_v22  ;;  %v889_v24 = vmul.f32 %v2672_v17, %v881_v23 }
 0x1ce   : > { %v897_v25 = vadd.f32 %v2673_v19, %v889_v24 }
 0x1d0   : > { %899 = vst [vmem:[#allocation2 + $0x8] sm:$0xff] %v897_v25 }
 0x1d1 PF: > { %v903_v26 = vld [vmem:[%s3778_s18 + $0x8] sm:$0xff]  ;;  %v906_v27 = vld [vmem:[%s3778_s18 + $0x20] sm:$0xff]  ;;  %v905_v30 = vld [vmem:[%s3778_s18 + $0x18] sm:$0xff]  ;;  %v3500_v33 = vmov 0.0   ;;  %vm3501_vm0 = vmmov 0   ;;  %v952_v13 = vlaneseq  ;;  %vm1120_vm1 = vcmask 523264   ;;  %s4383_s4 = scalar_lea.vmem %s4321_s7, %s3793_s16  ;;  %s4384_s29 = scalar_lea.vmem %s4322_s8, %s3793_s16 }
 0x1d2   : > { %v902_v28 = vld [vmem:[%s3778_s18] sm:$0xff]  ;;  %v3006_v29 = vpack.c.bf16 %v906_v27, %v903_v26  ;;  %v909_v31 = vld [vmem:[%s3778_s18 + $0x38] sm:$0xff]  ;;  %v912_v32 = vld [vmem:[%s3778_s18 + $0x50] sm:$0xff]  ;;  %1031 = vmatprep.mubr.f32.mxu0 %v3500_v33  ;;  %s4382_s24 = sld [smem:[#allocation19_spill]]  ;;  %vm1203_vm2 = vcmask 64512   ;;  %p2692_p7 = scmp.ne.s32.totalorder %s3631_s2, 1 }
 0x1d3   : > { %v3008_v34 = vpack.c.bf16 %v905_v30, %v902_v28  ;;  %v3010_v35 = vpack.c.bf16 %v912_v32, %v909_v31  ;;  %v908_v36 = vld [vmem:[%s3778_s18 + $0x30] sm:$0xff]  ;;  %v911_v37 = vld [vmem:[%s3778_s18 + $0x48] sm:$0xff]  ;;  %v918_v39 = vld [vmem:[%s3778_s18 + $0x80] sm:$0xff]  ;;  %v3896_v14 = vshrl.u32 %v952_v13, 7  ;;  %s4386_s20 = sld [smem:[#allocation26_spill]] (!%p2692_p7)  ;;  %vm3504_vm3 = vmmov (!%p2692_p7), 0  }
 0x1d4   : > { %v915_v38 = vld [vmem:[%s3778_s18 + $0x68] sm:$0xff]  ;;  %3007 = vmatprep.subr.bf16.mxu0 %v3006_v29  ;;  %v3012_v40 = vpack.c.bf16 %v911_v37, %v908_v36  ;;  %v914_v42 = vld [vmem:[%s3778_s18 + $0x60] sm:$0xff]  ;;  %v917_v43 = vld [vmem:[%s3778_s18 + $0x78] sm:$0xff]  ;;  %vm2263_vm4 = vcmask (!%p2692_p7), 1040384   ;;  %vm2452_vm5 = vcmask (!%p2692_p7), 9216  }
 0x1d5   : > { %3009 = vmatpush1.bf16.msra.mxu0 %v3008_v34  ;;  %v3014_v41 = vpack.c.bf16 %v918_v39, %v915_v38  ;;  %v921_v44 = vld [vmem:[%s3778_s18 + $0x98] sm:$0xff]  ;;  %v924_v45 = vld [vmem:[%s3778_s18 + $0xb0] sm:$0xff]  ;;  %v3016_v46 = vpack.c.bf16 %v917_v43, %v914_v42  ;;  %v923_v49 = vld [vmem:[%s3778_s18 + $0xa8] sm:$0xff]  ;;  %v3899_v15 = vsub.s32 1, %v3896_v14  ;;  %v3905_v17 = vsub.s32 0, %v3896_v14 }
 0x1d6   : > { %3011 = vmatprep.subr.bf16.mxu0 %v3010_v35  ;;  %v3018_v47 = vpack.c.bf16 %v924_v45, %v921_v44  ;;  %v920_v48 = vld [vmem:[%s3778_s18 + $0x90] sm:$0xff]  ;;  %v927_v50 = vld [vmem:[%s3778_s18 + $0xc8] sm:$0xff]  ;;  %v930_v51 = vld [vmem:[%s3778_s18 + $0xe0] sm:$0xff] }
 0x1d7   : > { %v3871_v52 = vld [vmem:[#allocation2] sm:$0xff]  ;;  %v3020_v53 = vpack.c.bf16 %v923_v49, %v920_v48  ;;  %v3022_v54 = vpack.c.bf16 %v930_v51, %v927_v50  ;;  %v926_v55 = vld [vmem:[%s3778_s18 + $0xc0] sm:$0xff]  ;;  %v929_v56 = vld [vmem:[%s3778_s18 + $0xd8] sm:$0xff] }
 0x1d8   : > { %2858 = vmatprep.mubr.f32.mxu1 %v3871_v52  ;;  %v933_v57 = vld [vmem:[%s3778_s18 + $0xf8] sm:$0xff]  ;;  %v936_v58 = vld [vmem:[%s3778_s18 + $0x110] sm:$0xff]  ;;  %v3024_v59 = vpack.c.bf16 %v929_v56, %v926_v55  ;;  %v935_v62 = vld [vmem:[%s3778_s18 + $0x108] sm:$0xff] }
 0x1d9   : > { %3013 = vmatpush1.bf16.msra.mxu0 %v3012_v40  ;;  %v3026_v60 = vpack.c.bf16 %v936_v58, %v933_v57  ;;  %v932_v61 = vld [vmem:[%s3778_s18 + $0xf0] sm:$0xff]  ;;  %v939_v63 = vld [vmem:[%s3778_s18 + $0x128] sm:$0xff]  ;;  %v942_v0 = vld [vmem:[%s3778_s18 + $0x140] sm:$0xff] }
 0x1da   : > { %3015 = vmatprep.subr.bf16.mxu0 %v3014_v41  ;;  %v3028_v1 = vpack.c.bf16 %v935_v62, %v932_v61  ;;  %v3030_v2 = vpack.c.bf16 %v942_v0, %v939_v63  ;;  %v938_v3 = vld [vmem:[%s3778_s18 + $0x120] sm:$0xff]  ;;  %v941_v4 = vld [vmem:[%s3778_s18 + $0x138] sm:$0xff]  ;;  %v948_v6 = vld [vmem:[%s3778_s18 + $0x170] sm:$0xff]  ;;  %v962_v0 = vsub.s32 2, %v3896_v14 }
 0x1db   : > { %v945_v5 = vld [vmem:[%s3778_s18 + $0x158] sm:$0xff]  ;;  %v3032_v7 = vpack.c.bf16 %v941_v4, %v938_v3  ;;  %v944_v9 = vld [vmem:[%s3778_s18 + $0x150] sm:$0xff]  ;;  %v947_v10 = vld [vmem:[%s3778_s18 + $0x168] sm:$0xff] }
 0x1dc   : > { %v3034_v8 = vpack.c.bf16 %v948_v6, %v945_v5  ;;  %v3036_v11 = vpack.c.bf16 %v947_v10, %v944_v9  ;;  %v3891_v12 = vld [vmem:[#allocation2 + $0x8] sm:$0xff]  ;;  %v3902_v16 = vld [vmem:[%s3809_s0] sm:$0x7]  ;;  %s3502_s0 = smov 64   ;;  %v907_v27 = vld [vmem:[%s3778_s18 + $0x28] sm:$0xff] }
 0x1dd   : > { %3017 = vmatpush1.bf16.msra.mxu0 %v3016_v46  ;;  %v3909_v18 = vrot.slane %v3902_v16, %v3899_v15  ;;  %v3913_v20 = vrot.slane %v3902_v16, %v3905_v17  ;;  %v904_v26 = vld [vmem:[%s3778_s18 + $0x10] sm:$0xff]  ;;  %v910_v28 = vld [vmem:[%s3778_s18 + $0x40] sm:$0xff]  ;;  %v913_v30 = vld [vmem:[%s3778_s18 + $0x58] sm:$0xff] }
 0x1de   : > { %3019 = vmatprep.subr.bf16.mxu0 %v3018_v47  ;;  %v3038_v29 = vpack.c.bf16 %v907_v27, %v904_v26  ;;  %v3042_v31 = vpack.c.bf16 %v913_v30, %v910_v28  ;;  %v916_v32 = vld [vmem:[%s3778_s18 + $0x70] sm:$0xff]  ;;  %v919_v34 = vld [vmem:[%s3778_s18 + $0x88] sm:$0xff]  ;;  %v922_v36 = vld [vmem:[%s3778_s18 + $0xa0] sm:$0xff] }
 0x1df   : > { %v3046_v35 = vpack.c.bf16 %v919_v34, %v916_v32  ;;  %v925_v37 = vld [vmem:[%s3778_s18 + $0xb8] sm:$0xff]  ;;  %v928_v39 = vld [vmem:[%s3778_s18 + $0xd0] sm:$0xff]  ;;  %v931_v40 = vld [vmem:[%s3778_s18 + $0xe8] sm:$0xff] }
 0x1e0   : > { %3039 = vmatprep.subr.bf16.mxu1 %v3038_v29  ;;  %v3050_v38 = vpack.c.bf16 %v925_v37, %v922_v36  ;;  %v3054_v41 = vpack.c.bf16 %v931_v40, %v928_v39  ;;  %v934_v42 = vld [vmem:[%s3778_s18 + $0x100] sm:$0xff]  ;;  %v937_v43 = vld [vmem:[%s3778_s18 + $0x118] sm:$0xff]  ;;  %v940_v45 = vld [vmem:[%s3778_s18 + $0x130] sm:$0xff] }
 0x1e1   : > { %3021 = vmatpush1.bf16.msra.mxu0 %v3020_v53  ;;  %3041 = vmatpush3.bf16.msra.mxu1 %v3038_v29  ;;  %v3058_v44 = vpack.c.bf16 %v937_v43, %v934_v42  ;;  %v943_v46 = vld [vmem:[%s3778_s18 + $0x148] sm:$0xff]  ;;  %v946_v48 = vld [vmem:[%s3778_s18 + $0x160] sm:$0xff]  ;;  %v949_v49 = vld [vmem:[%s3778_s18 + $0x178] sm:$0xff]  ;;  %s4388_s18 = sld [smem:[#allocation27_spill]] (!%p2692_p7) }
 0x1e2   : > { %3023 = vmatprep.subr.bf16.mxu0 %v3022_v54  ;;  %3043 = vmatprep.subr.bf16.mxu1 %v3042_v31  ;;  %v3062_v47 = vpack.c.bf16 %v943_v46, %v940_v45  ;;  %v3066_v50 = vpack.c.bf16 %v949_v49, %v946_v48  ;;  %v3951_v51 = vld [vmem:[%s4382_s24] sm:$0x3] }
 0x1e3   : > { %v1201_v53 = vrot.slane %v3951_v51, %v3905_v17 }
 0x1e5   : > { %3025 = vmatpush1.bf16.msra.mxu0 %v3024_v59  ;;  %3045 = vmatpush3.bf16.msra.mxu1 %v3042_v31 }
 0x1e6   : > { %3027 = vmatprep.subr.bf16.mxu0 %v3026_v60  ;;  %3047 = vmatprep.subr.bf16.mxu1 %v3046_v35 }
 0x1e9   : > { %3029 = vmatpush1.bf16.msra.mxu0 %v3028_v1  ;;  %3049 = vmatpush3.bf16.msra.mxu1 %v3046_v35  ;;  %v963_v1 = vrot.slane %v3902_v16, %v962_v0  ;;  %v1541_v35 = vrot.slane %v3951_v51, %v3899_v15 }
 0x1ea   : > { %3031 = vmatprep.subr.bf16.mxu0 %v3030_v2  ;;  %3051 = vmatprep.subr.bf16.mxu1 %v3050_v38 }
 0x1ed   : > { %3033 = vmatpush1.bf16.msra.mxu0 %v3032_v7  ;;  %3053 = vmatpush3.bf16.msra.mxu1 %v3050_v38 }
 0x1ee   : > { %3035 = vmatprep.subr.bf16.mxu0 %v3034_v8  ;;  %3055 = vmatprep.subr.bf16.mxu1 %v3054_v41 }
 0x1f1   : > { %3037 = vmatpush1.bf16.msra.mxu0 %v3036_v11  ;;  %3057 = vmatpush3.bf16.msra.mxu1 %v3054_v41 }
 0x1f2   : > { %2861 = vmatprep.subr.mxu0 %v3500_v33  ;;  %3059 = vmatprep.subr.bf16.mxu1 %v3058_v44 }
 0x1f4   : > { %1032 = vmatmul.mubr.f32.vlgmr.msra.gmra.mrb[0].mxu0 %v3871_v52 }
 0x1f5   : > { %1037 = vmatprep.mubr.f32.mxu0 %v3500_v33  ;;  %3061 = vmatpush3.bf16.msra.mxu1 %v3058_v44 }
 0x1f6   : > { %3063 = vmatprep.subr.bf16.mxu1 %v3062_v47 }
 0x1f8   : > { %1038 = vmatmul.mubr.f32.gmra.mrb[2].mxu0 %v3891_v12 }
 0x1f9   : > { %2863 = vmatprep.mubr.msk.f32.mxu0 %vm3501_vm0, %v3500_v33  ;;  %3065 = vmatpush3.bf16.msra.mxu1 %v3062_v47 }
 0x1fa   : > { %3067 = vmatprep.subr.bf16.mxu1 %v3066_v50 }
 0x1fd   : > { %3069 = vmatpush3.bf16.msra.mxu1 %v3066_v50 }
 0x1fe   : > { %2891 = vmatprep.subr.mxu1 %v3500_v33 }
 0x200   : > { %2859 = vmatmul.mubr.f32.vlgmr.msra.gmra.mrb[0].mxu1 %v3891_v12 }
 0x201   : > { %2893 = vmatprep.mubr.msk.f32.mxu1 %vm3501_vm0, %v3500_v33 }
 0x2c7   : > { %v1033_v19 = vpop.f32.mrb[0].mxu0 }
 0x2c8   : > { %v1035_v21 = vpop.f32.mrb[1].mxu0  ;;  %v1034_v23 = vadd.f32 %v1033_v19, %v3913_v20 }
 0x2c9   : > { %v1036_v22 = vadd.f32 %v1035_v21, %v3909_v18 }
 0x2cb   : > { %1290 = vrot.lane.b32.xlu1 %v1036_v22, %s3502_s0  ;;  %2862 = vmatpush3.xpose.msk.msra.mxu0 %vm1120_vm1, %v1036_v22  ;;  %v3924_v24 = vpop.f32.mrb[2].mxu0 }
 0x2cc   : > { %2866 = vmatprep.subr.mxu0 %v3500_v33  ;;  %v3926_v25 = vpop.f32.mrb[3].mxu0  ;;  %v1040_v26 = vadd.f32 %v3924_v24, %v3913_v20 }
 0x2ce   : > { %2864 = vmatmul.mubr.msk.f32.vlgmr.msra.gmra.mrb[4].mxu0 %vm1120_vm1, %v1034_v23 }
 0x2cf   : > { %1288 = vrot.lane.b32.xlu1 %v1034_v23, %s3502_s0  ;;  %2868 = vmatprep.mubr.msk.f32.mxu0 %vm3501_vm0, %v3500_v33  ;;  %v1042_v23 = vadd.f32 %v3926_v25, %v3909_v18 }
 0x2d3   : > { %v2860_v2 = vpop.f32.mrb[0].mxu1 }
 0x2d4   : > { %v1110_v3 = vpop.f32.mrb[1].mxu1  ;;  %v3959_v4 = vadd.f32 %v2860_v2, %v963_v1  ;;  %v1800_v2 = vld [vmem:[%s3800_s28] sm:$0xff] }
 0x2d5   : > { %v1111_v5 = vadd.f32 %v1110_v3, %v963_v1  ;;  %v1801_v3 = vld [vmem:[%s3800_s28 + $0x8] sm:$0xff] }
 0x2d7   : > { %2867 = vmatpush3.msra.mxu0 %v1111_v5 }
 0x2d8   : > { %2871 = vmatprep.subr.mxu0 %v3500_v33 }
 0x33d   : > { %v1291_v8 = vpop.permute.xlu1 %1290 }
 0x341   : > { %v1289_v10 = vpop.permute.xlu1 %1288 }
 0x3a1   : > { %v1193_v54 = vpop.f32.mrb[4].mxu0 }
 0x3a2   : > { %v1197_v55 = vmul.f32 0.125, %v1193_v54  ;;  %v2865_v56 = vpop.f32.mrb[5].mxu0 }
 0x3a4   : > { %v1202_v57 = vadd.f32 %v1201_v53, %v1197_v55 }
 0x3a6   : > { %v1204_v58 = vsel %vm1203_vm2, %v1202_v57, -inf }
 0x3a7   : > { %1205 = vmax.xlane.f32.xlu0 %v1204_v58 }
 0x434   : > { %v1206_v59 = vpop.xlane.xlu0 %1205 }
 0x435   : > { %v1207_v60 = vsub.f32 %v1202_v57, %v1206_v59 }
 0x437   : > { %v1208_v61 = vmul.f32 1.442695, %v1207_v60 }
 0x439   : > { %3295 = vpow2.f32 %v1208_v61 }
 0x443   : > { %v3296_v62 = vpop.eup %3295 }
 0x444   : > { %v1210_v63 = vsel %vm1203_vm2, %v3296_v62, 0.0 }
 0x445   : > { %1211 = vadd.xlane.f32.xlu0 %v1210_v63 }
 0x4d2   : > { %v1212_v6 = vpop.xlane.xlu0 %1211 }
 0x4d3   : > { %3297 = vrcp.f32 %v1212_v6  ;;  %v1803_v6 = vld [vmem:[%s3800_s28 + $0x18] sm:$0xff] }
 0x4dd   : > { %v3298_v7 = vpop.eup %3297 }
 0x4de   : > { %v1214_v9 = vmul.f32 %v3298_v7, %v3296_v62 }
 0x4e0   : > { %2869 = vmatmul.mubr.msk.f32.vlgmr.msra.gmra.mrb[6].mxu0 %vm1203_vm2, %v1214_v9  ;;  %v1805_v9 = vld [vmem:[%s3800_s28 + $0x28] sm:$0xff] }
 0x4e1   : > { %2872 = vmatpush3.xpose.msk.msra.mxu0 %vm1120_vm1, %v1291_v8  ;;  %2873 = vmatprep.mubr.msk.f32.mxu0 %vm3501_vm0, %v3500_v33  ;;  %v1804_v8 = vld [vmem:[%s3800_s28 + $0x20] sm:$0xff] }
 0x4e2   : > { %2876 = vmatprep.subr.mxu0 %v3500_v33 }
 0x4e4   : > { %2874 = vmatmul.mubr.msk.f32.vlgmr.msra.gmra.mrb[8].mxu0 %vm1120_vm1, %v1289_v10  ;;  %v3078_v10 = vpack.c.bf16 %v1805_v9, %v1804_v8  ;;  %v1954_v8 = vld [vmem:[%s3785_s23 + $0x68] sm:$0xff]  ;;  %v1956_v9 = vld [vmem:[%s3785_s23 + $0x78] sm:$0xff] }
 0x4e5   : > { %2878 = vmatprep.mubr.msk.f32.mxu0 %vm3501_vm0, %v3500_v33 }
 0x5b3   : > { %v3970_v11 = vpop.f32.mrb[6].mxu0 }
 0x5b4   : > { %v2870_v13 = vpop.f32.mrb[7].mxu0 }
 0x5b5   : > { %v1806_v13 = vld [vmem:[%s3800_s28 + $0x30] sm:$0xff] }
 0x5b7   : > { %v1362_v14 = vpop.f32.mrb[8].mxu0 }
 0x5b8   : > { %v1366_v16 = vmul.f32 0.125, %v1362_v14  ;;  %v2875_v19 = vpop.f32.mrb[9].mxu0  ;;  %v1807_v14 = vld [vmem:[%s3800_s28 + $0x38] sm:$0xff] }
 0x5b9   : > { %v1808_v19 = vld [vmem:[%s3800_s28 + $0x40] sm:$0xff] }
 0x5ba   : > { %v1367_v21 = vadd.f32 %v1366_v16, %v1201_v53  ;;  %v3082_v16 = vpack.c.bf16 %v1807_v14, %v1806_v13  ;;  %v1953_v13 = vld [vmem:[%s3785_s23 + $0x60] sm:$0xff]  ;;  %v1955_v14 = vld [vmem:[%s3785_s23 + $0x70] sm:$0xff] }
 0x5bc   : > { %v1368_v22 = vsel %vm1203_vm2, %v1367_v21, -inf }
 0x5bd   : > { %1369 = vmax.xlane.f32.xlu0 %v1368_v22 }
 0x5d3   : > { %1380 = vrot.lane.b32.xlu0 %v1111_v5, %s3502_s0  ;;  %v3070_v5 = vpack.c.bf16 %v1801_v3, %v1800_v2 }
 0x5d7   : > { %1629 = vrot.lane.b32.xlu0 %v1042_v23, %s3502_s0 }
 0x5db   : > { %1627 = vrot.lane.b32.xlu0 %v1040_v26, %s3502_s0 }
 0x64a   : > { %v1370_v27 = vpop.xlane.xlu0 %1369 }
 0x64b   : > { %v1371_v28 = vsub.f32 %v1367_v21, %v1370_v27  ;;  %v1809_v21 = vld [vmem:[%s3800_s28 + $0x48] sm:$0xff] }
 0x64c   : > { %v3086_v22 = vpack.c.bf16 %v1809_v21, %v1808_v19  ;;  %v1958_v19 = vld [vmem:[%s3785_s23 + $0x88] sm:$0xff]  ;;  %v1960_v21 = vld [vmem:[%s3785_s23 + $0x98] sm:$0xff] }
 0x64d   : > { %v1372_v29 = vmul.f32 1.442695, %v1371_v28  ;;  %v1812_v28 = vld [vmem:[%s3800_s28 + $0x60] sm:$0xff] }
 0x64e   : > { %v1381_v30 = vpop.permute.xlu0 %1380 }
 0x64f   : > { %3299 = vpow2.f32 %v1372_v29  ;;  %2877 = vmatpush3.msra.mxu0 %v1381_v30  ;;  %v1813_v29 = vld [vmem:[%s3800_s28 + $0x68] sm:$0xff] }
 0x650   : > { %2881 = vmatprep.subr.mxu0 %v3500_v33  ;;  %v3094_v30 = vpack.c.bf16 %v1813_v29, %v1812_v28  ;;  %v1962_v28 = vld [vmem:[%s3785_s23 + $0xa8] sm:$0xff]  ;;  %v1964_v29 = vld [vmem:[%s3785_s23 + $0xb8] sm:$0xff] }
 0x652   : > { %v1630_v31 = vpop.permute.xlu0 %1629 }
 0x653   : > { %2892 = vmatpush3.xpose.msk.msra.mxu1 %vm1120_vm1, %v1630_v31  ;;  %v1814_v31 = vld [vmem:[%s3800_s28 + $0x70] sm:$0xff] }
 0x654   : > { %3071 = vmatprep.subr.bf16.mxu1 %v3070_v5 }
 0x656   : > { %v1628_v32 = vpop.permute.xlu0 %1627 }
 0x657   : > { %2894 = vmatmul.mubr.msk.f32.vlgmr.msra.gmra.mrb[2].mxu1 %vm1120_vm1, %v1628_v32  ;;  %v1815_v32 = vld [vmem:[%s3800_s28 + $0x78] sm:$0xff] }
 0x658   : > { %3073 = vmatpush3.bf16.msra.mxu1 %v3070_v5 }
 0x659   : > { %v3300_v18 = vpop.eup %3299 }
 0x65a   : > { %v1374_v25 = vsel %vm1203_vm2, %v3300_v18, 0.0 }
 0x65b   : > { %1375 = vadd.xlane.f32.xlu1 %v1374_v25 }
 0x6e8   : > { %v1376_v20 = vpop.xlane.xlu1 %1375 }
 0x6e9   : > { %3301 = vrcp.f32 %v1376_v20 }
 0x6f3   : > { %v3302_v24 = vpop.eup %3301 }
 0x6f4   : > { %v1378_v34 = vmul.f32 %v3302_v24, %v3300_v18  ;;  %v3098_v18 = vpack.c.bf16 %v1815_v32, %v1814_v31  ;;  %v1961_v31 = vld [vmem:[%s3785_s23 + $0xa0] sm:$0xff]  ;;  %v1963_v32 = vld [vmem:[%s3785_s23 + $0xb0] sm:$0xff] }
 0x6f6   : > { %2879 = vmatmul.mubr.msk.f32.vlgmr.msra.gmra.mrb[10].mxu0 %vm1203_vm2, %v1378_v34 }
 0x6f7   : > { %2882 = vmatpush3.xpose.msk.msra.mxu0 %vm1120_vm1, %v1042_v23  ;;  %2883 = vmatprep.mubr.msk.f32.mxu0 %vm3501_vm0, %v3500_v33  ;;  %v1810_v23 = vld [vmem:[%s3800_s28 + $0x50] sm:$0xff] }
 0x6f8   : > { %2886 = vmatprep.subr.mxu0 %v3500_v33 }
 0x6fa   : > { %2884 = vmatmul.mubr.msk.f32.vlgmr.msra.gmra.mrb[12].mxu0 %vm1120_vm1, %v1040_v26  ;;  %v1811_v26 = vld [vmem:[%s3800_s28 + $0x58] sm:$0xff] }
 0x6fb   : > { %2887 = vmatpush3.msra.mxu0 %v3959_v4  ;;  %2888 = vmatprep.mubr.msk.f32.mxu0 %vm3501_vm0, %v3500_v33  ;;  %v3090_v27 = vpack.c.bf16 %v1811_v26, %v1810_v23  ;;  %v1957_v23 = vld [vmem:[%s3785_s23 + $0x80] sm:$0xff]  ;;  %v1959_v26 = vld [vmem:[%s3785_s23 + $0x90] sm:$0xff] }
 0x6fc   : > { %2896 = vmatprep.subr.mxu0 %v3500_v33 }
 0x72a   : > { %v1701_v36 = vpop.f32.mrb[2].mxu1 }
 0x72b   : > { %v1705_v37 = vmul.f32 0.125, %v1701_v36  ;;  %v2895_v38 = vpop.f32.mrb[3].mxu1 }
 0x72d   : > { %v1706_v39 = vadd.f32 %v1705_v37, %v1541_v35 }
 0x72f   : > { %v1707_v40 = vsel %vm1203_vm2, %v1706_v39, -inf }
 0x730   : > { %1708 = vmax.xlane.f32.xlu1 %v1707_v40 }
 0x7bd   : > { %v1709_v41 = vpop.xlane.xlu1 %1708 }
 0x7be   : > { %v1710_v42 = vsub.f32 %v1706_v39, %v1709_v41  ;;  %v2686_v41 = vld [vmem:[%s4383_s4] ss:$0 sm:$0xff] }
 0x7c0   : > { %v1711_v43 = vmul.f32 1.442695, %v1710_v42 }
 0x7c2   : > { %3303 = vpow2.f32 %v1711_v43 }
 0x7c9   : > { %v3997_v44 = vpop.f32.mrb[10].mxu0 }
 0x7ca   : > { %v2880_v45 = vpop.f32.mrb[11].mxu0 }
 0x7cc   : > { %v3304_v46 = vpop.eup %3303 }
 0x7cd   : > { %v1533_v47 = vpop.f32.mrb[12].mxu0  ;;  %v1713_v48 = vsel %vm1203_vm2, %v3304_v46, 0.0 }
 0x7ce   : > { %v1537_v49 = vmul.f32 0.125, %v1533_v47  ;;  %1714 = vadd.xlane.f32.xlu1 %v1713_v48  ;;  %v2885_v50 = vpop.f32.mrb[13].mxu0  ;;  %v1942_v47 = vld [vmem:[%s3785_s23 + $0x8] sm:$0xff]  ;;  %v1944_v48 = vld [vmem:[%s3785_s23 + $0x18] sm:$0xff] }
 0x7cf   : > { %v3102_v50 = vpack.c.bf16 %v1944_v48, %v1942_v47 }
 0x7d0   : > { %v1542_v51 = vadd.f32 %v1541_v35, %v1537_v49  ;;  %v1941_v49 = vld [vmem:[%s3785_s23] sm:$0xff] }
 0x7d2   : > { %v1543_v53 = vsel %vm1203_vm2, %v1542_v51, -inf }
 0x7d3   : > { %1544 = vmax.xlane.f32.xlu0 %v1543_v53  ;;  %v1946_v53 = vld [vmem:[%s3785_s23 + $0x28] sm:$0xff] }
 0x85b   : > { %v1715_v59 = vpop.xlane.xlu1 %1714 }
 0x860   : > { %v1545_v54 = vpop.xlane.xlu0 %1544 }
 0x861   : > { %v1546_v55 = vsub.f32 %v1542_v51, %v1545_v54  ;;  %v1943_v51 = vld [vmem:[%s3785_s23 + $0x10] sm:$0xff]  ;;  %v1948_v54 = vld [vmem:[%s3785_s23 + $0x38] sm:$0xff] }
 0x863   : > { %v1547_v56 = vmul.f32 1.442695, %v1546_v55  ;;  %v3104_v55 = vpack.c.bf16 %v1943_v51, %v1941_v49 }
 0x865   : > { %3305 = vpow2.f32 %v1547_v56  ;;  %v3106_v56 = vpack.c.bf16 %v1948_v54, %v1946_v53 }
 0x86f   : > { %v3306_v57 = vpop.eup %3305 }
 0x870   : > { %v1549_v58 = vsel %vm1203_vm2, %v3306_v57, 0.0 }
 0x871   : > { %1550 = vadd.xlane.f32.xlu1 %v1549_v58  ;;  %v1947_v58 = vld [vmem:[%s3785_s23 + $0x30] sm:$0xff] }
 0x882   : > { %1719 = vrot.lane.b32.xlu1 %v3959_v4, %s3502_s0  ;;  %v1802_v4 = vld [vmem:[%s3800_s28 + $0x10] sm:$0xff] }
 0x883   : > { %v3074_v7 = vpack.c.bf16 %v1803_v6, %v1802_v4 }
 0x885   : > { %3075 = vmatprep.subr.bf16.mxu1 %v3074_v7 }
 0x886   : > { %3077 = vmatpush3.bf16.msra.mxu1 %v3074_v7 }
 0x887   : > { %3079 = vmatprep.subr.bf16.mxu1 %v3078_v10 }
 0x88a   : > { %3081 = vmatpush3.bf16.msra.mxu1 %v3078_v10  ;;  %v3114_v10 = vpack.c.bf16 %v1956_v9, %v1954_v8  ;;  %v2103_v8 = vld [vmem:[%s3837_s12 + $0x28] sm:$0xff] }
 0x88b   : > { %3083 = vmatprep.subr.bf16.mxu1 %v3082_v16 }
 0x88e   : > { %3085 = vmatpush3.bf16.msra.mxu1 %v3082_v16  ;;  %v3116_v16 = vpack.c.bf16 %v1955_v14, %v1953_v13  ;;  %v2121_v13 = vld [vmem:[%s3837_s12 + $0xb8] sm:$0xff] }
 0x88f   : > { %3087 = vmatprep.subr.bf16.mxu1 %v3086_v22 }
 0x892   : > { %3089 = vmatpush3.bf16.msra.mxu1 %v3086_v22  ;;  %v3118_v22 = vpack.c.bf16 %v1960_v21, %v1958_v19  ;;  %v2105_v19 = vld [vmem:[%s3837_s12 + $0x38] sm:$0xff] }
 0x893   : > { %3091 = vmatprep.subr.bf16.mxu1 %v3090_v27 }
 0x896   : > { %3093 = vmatpush3.bf16.msra.mxu1 %v3090_v27  ;;  %v3120_v27 = vpack.c.bf16 %v1959_v26, %v1957_v23  ;;  %v2123_v23 = vld [vmem:[%s3837_s12 + $0xc8] sm:$0xff]  ;;  %v2106_v26 = vld [vmem:[%s3837_s12 + $0x40] sm:$0xff] }
 0x897   : > { %3095 = vmatprep.subr.bf16.mxu1 %v3094_v30 }
 0x89a   : > { %3097 = vmatpush3.bf16.msra.mxu1 %v3094_v30  ;;  %v3122_v30 = vpack.c.bf16 %v1964_v29, %v1962_v28  ;;  %v2107_v28 = vld [vmem:[%s3837_s12 + $0x48] sm:$0xff]  ;;  %v2124_v29 = vld [vmem:[%s3837_s12 + $0xd0] sm:$0xff] }
 0x89b   : > { %3099 = vmatprep.subr.bf16.mxu1 %v3098_v18 }
 0x89e   : > { %3101 = vmatpush3.bf16.msra.mxu1 %v3098_v18  ;;  %v1966_v18 = vld [vmem:[%s3785_s23 + $0xc8] sm:$0xff] }
 0x8fe   : > { %v1551_v60 = vpop.xlane.xlu1 %1550 }
 0x8ff   : > { %3307 = vrcp.f32 %v1551_v60 }
 0x900   : > { %3309 = vrcp.f32 %v1715_v59  ;;  %v1950_v59 = vld [vmem:[%s3785_s23 + $0x48] sm:$0xff] }
 0x902   : > { %v1720_v0 = vpop.permute.xlu1 %1719 }
 0x909   : > { %v3308_v61 = vpop.eup %3307 }
 0x90a   : > { %v1553_v62 = vmul.f32 %v3308_v61, %v3306_v57  ;;  %v3310_v63 = vpop.eup %3309  ;;  %v1945_v57 = vld [vmem:[%s3785_s23 + $0x20] sm:$0xff] }
 0x90b   : > { %v1717_v1 = vmul.f32 %v3310_v63, %v3304_v46  ;;  %v1949_v61 = vld [vmem:[%s3785_s23 + $0x40] sm:$0xff] }
 0x90c   : > { %2889 = vmatmul.mubr.msk.f32.vlgmr.msra.gmra.mrb[14].mxu0 %vm1203_vm2, %v1553_v62  ;;  %v1951_v62 = vld [vmem:[%s3785_s23 + $0x50] sm:$0xff] }
 0x90d   : > { %2897 = vmatpush3.msra.mxu0 %v1720_v0  ;;  %2898 = vmatprep.mubr.msk.f32.mxu0 %vm3501_vm0, %v3500_v33  ;;  %v3112_v63 = vpack.c.bf16 %v1951_v62, %v1949_v61 }
 0x90e   : > { %3103 = vmatprep.subr.bf16.mxu0 %v3102_v50 }
 0x910   : > { %2899 = vmatmul.mubr.msk.f32.vlgmr.msra.gmra.mrb[16].mxu0 %vm1203_vm2, %v1717_v1 }
 0x911   : > { %2049 = vmatprep.mubr.f32.mxu0 %v3500_v33  ;;  %3105 = vmatpush1.bf16.msra.mxu0 %v3104_v55 }
 0x912   : > { %3107 = vmatprep.subr.bf16.mxu0 %v3106_v56  ;;  %v2687_v56 = vld [vmem:[%s4384_s29] ss:$0 sm:$0xff] }
 0x9df   : > { %v1623_v25 = vpop.f32.mrb[14].mxu0 }
 0x9e0   : > { %v2890_v20 = vpop.f32.mrb[15].mxu0 }
 0x9e1   : > { %v1968_v20 = vld [vmem:[%s3785_s23 + $0xd8] sm:$0xff] }
 0x9e3   : > { %v1791_v24 = vpop.f32.mrb[16].mxu0 }
 0x9e4   : > { %v3290_v34 = vpack.i.bf16 %v1791_v24, %v3997_v44  ;;  %v2900_v35 = vpop.f32.mrb[17].mxu0  ;;  %v1965_v24 = vld [vmem:[%s3785_s23 + $0xc0] sm:$0xff] }
 0x9e5   : > { %v3126_v35 = vpack.c.bf16 %v1968_v20, %v1966_v18  ;;  %v2108_v18 = vld [vmem:[%s3837_s12 + $0x50] sm:$0xff]  ;;  %v2126_v20 = vld [vmem:[%s3837_s12 + $0xe0] sm:$0xff] }
 0x9e6   : > { %3291 = vrot.lane.b32.xlu0 %v3290_v34, %s3502_s0  ;;  %v1967_v34 = vld [vmem:[%s3785_s23 + $0xd0] sm:$0xff] }
 0xa58   : > { %v3292_v36 = vpop.permute.xlu0 %3291 }
 0xa59   : > { %v3294_v37 = vunpack.i.h.bf16 %v3292_v36  ;;  %v3293_v38 = vunpack.i.l.bf16 %v3292_v36  ;;  %v1970_v36 = vld [vmem:[%s3785_s23 + $0xe8] sm:$0xff] }
 0xa5b   : > { %v1460_v39 = vsel %vm1120_vm1, %v3970_v11, %v3293_v38  ;;  %v1799_v40 = vsel %vm1120_vm1, %v1623_v25, %v3294_v37  ;;  %v3124_v25 = vpack.c.bf16 %v1963_v32, %v1961_v31  ;;  %v1972_v37 = vld [vmem:[%s3785_s23 + $0xf8] sm:$0xff]  ;;  %v3128_v38 = vpack.c.bf16 %v1967_v34, %v1965_v24  ;;  %v2127_v24 = vld [vmem:[%s3837_s12 + $0xe8] sm:$0xff] }
 0xa5c   : > { %2933 = vmatprep.mubr.f32.mxu1 %v1460_v39  ;;  %v3130_v39 = vpack.c.bf16 %v1972_v37, %v1970_v36  ;;  %v3152_v31 = vpack.c.bf16 %v2107_v28, %v2106_v26  ;;  %v2110_v36 = vld [vmem:[%s3837_s12 + $0x60] sm:$0xff]  ;;  %v2111_v37 = vld [vmem:[%s3837_s12 + $0x68] sm:$0xff] }
 0xa5d   : > { %2934 = vmatmul.mubr.f32.vlgmr.msra.gmra.mrb[4].mxu1 %v1799_v40  ;;  %v1969_v40 = vld [vmem:[%s3785_s23 + $0xe0] sm:$0xff] }
 0xb30   : > { %v2935_v42 = vpop.f32.mrb[4].mxu1 }
 0xb31   : > { %v1895_v43 = vadd.f32 %v2935_v42, %v2686_v41  ;;  %v1889_v44 = vpop.f32.mrb[5].mxu1 }
 0xb32   : > { %v1890_v45 = vadd.f32 %v2686_v41, %v1889_v44  ;;  %v1971_v41 = vld [vmem:[%s3785_s23 + $0xf0] sm:$0xff]  ;;  %v2115_v44 = vld [vmem:[%s3837_s12 + $0x88] sm:$0xff] }
 0xb33   : > { %v1899_v11 = vadd.f32 %v1895_v43, %v3891_v12  ;;  %v1952_v12 = vld [vmem:[%s3785_s23 + $0x58] sm:$0xff]  ;;  %v3132_v42 = vpack.c.bf16 %v1971_v41, %v1969_v40  ;;  %v2114_v43 = vld [vmem:[%s3837_s12 + $0x80] sm:$0xff]  ;;  %v3160_v40 = vpack.c.bf16 %v2111_v37, %v2110_v36  ;;  %s4389_s23 = sld [smem:[#allocation29_spill]] (!%p2692_p7) }
 0xb34   : > { %v1898_v46 = vadd.f32 %v1890_v45, %v3871_v52  ;;  %v3108_v52 = vpack.c.bf16 %v1947_v58, %v1945_v57  ;;  %v3110_v60 = vpack.c.bf16 %v1952_v12, %v1950_v59  ;;  %v2098_v45 = vld [vmem:[%s3837_s12] sm:$0xff]  ;;  %v2688_v58 = vld [vmem:[%s837_s21] ss:$0 sm:$0xff] }
 0xb35   : > { %1904 = vadd.xlane.f32.xlu0 %v1899_v11 }
 0xb36   : > { %1902 = vadd.xlane.f32.xlu1 %v1898_v46  ;;  %3109 = vmatpush1.bf16.msra.mxu0 %v3108_v52 }
 0xb37   : > { %3111 = vmatprep.subr.bf16.mxu0 %v3110_v60 }
 0xb3a   : > { %3113 = vmatpush1.bf16.msra.mxu0 %v3112_v63  ;;  %v2116_v63 = vld [vmem:[%s3837_s12 + $0x90] sm:$0xff] }
 0xb3b   : > { %3115 = vmatprep.subr.bf16.mxu0 %v3114_v10  ;;  %v2120_v10 = vld [vmem:[%s3837_s12 + $0xb0] sm:$0xff] }
 0xb3c   : > { %v3146_v14 = vpack.c.bf16 %v2121_v13, %v2120_v10 }
 0xb3e   : > { %3117 = vmatpush1.bf16.msra.mxu0 %v3116_v16  ;;  %v2104_v16 = vld [vmem:[%s3837_s12 + $0x30] sm:$0xff] }
 0xb3f   : > { %3119 = vmatprep.subr.bf16.mxu0 %v3118_v22  ;;  %v3148_v21 = vpack.c.bf16 %v2105_v19, %v2104_v16  ;;  %v2122_v22 = vld [vmem:[%s3837_s12 + $0xc0] sm:$0xff] }
 0xb42   : > { %3121 = vmatpush1.bf16.msra.mxu0 %v3120_v27  ;;  %v3150_v27 = vpack.c.bf16 %v2123_v23, %v2122_v22 }
 0xb43   : > { %3123 = vmatprep.subr.bf16.mxu0 %v3122_v30  ;;  %v2125_v30 = vld [vmem:[%s3837_s12 + $0xd8] sm:$0xff] }
 0xb44   : > { %v3154_v32 = vpack.c.bf16 %v2125_v30, %v2124_v29 }
 0xb46   : > { %3125 = vmatpush1.bf16.msra.mxu0 %v3124_v25  ;;  %v2109_v25 = vld [vmem:[%s3837_s12 + $0x58] sm:$0xff] }
 0xb47   : > { %3127 = vmatprep.subr.bf16.mxu0 %v3126_v35  ;;  %v3156_v34 = vpack.c.bf16 %v2109_v25, %v2108_v18  ;;  %v3158_v35 = vpack.c.bf16 %v2127_v24, %v2126_v20  ;;  %v2689_v25 = vld [vmem:[%s844_s19] ss:$0 sm:$0xff] }
 0xb4a   : > { %3129 = vmatpush1.bf16.msra.mxu0 %v3128_v38  ;;  %v2128_v38 = vld [vmem:[%s3837_s12 + $0xf0] sm:$0xff] }
 0xb4b   : > { %3131 = vmatprep.subr.bf16.mxu0 %v3130_v39  ;;  %v2129_v39 = vld [vmem:[%s3837_s12 + $0xf8] sm:$0xff] }
 0xb4c   : > { %v3162_v41 = vpack.c.bf16 %v2129_v39, %v2128_v38 }
 0xb4e   : > { %3133 = vmatpush1.bf16.msra.mxu0 %v3132_v42  ;;  %v2112_v42 = vld [vmem:[%s3837_s12 + $0x70] sm:$0xff] }
 0xbc2   : > { %v1905_v0 = vpop.xlane.xlu0 %1904 }
 0xbc3   : > { %v1903_v1 = vpop.xlane.xlu1 %1902  ;;  %v1908_v2 = vmul.f32 0.0078125, %v1905_v0  ;;  %v2117_v0 = vld [vmem:[%s3837_s12 + $0x98] sm:$0xff] }
 0xbc4   : > { %v1907_v3 = vmul.f32 0.0078125, %v1903_v1  ;;  %v3138_v1 = vpack.c.bf16 %v2117_v0, %v2116_v63 }
 0xbc5   : > { %v4051_v5 = vsub.f32 %v1899_v11, %v1908_v2  ;;  %v3134_v11 = vpack.c.bf16 %v2115_v44, %v2114_v43  ;;  %v2100_v2 = vld [vmem:[%s3837_s12 + $0x10] sm:$0xff]  ;;  %v2113_v43 = vld [vmem:[%s3837_s12 + $0x78] sm:$0xff] }
 0xbc6   : > { %v4049_v4 = vsub.f32 %v1898_v46, %v1907_v3  ;;  %v2099_v46 = vld [vmem:[%s3837_s12 + $0x8] sm:$0xff]  ;;  %v2101_v3 = vld [vmem:[%s3837_s12 + $0x18] sm:$0xff]  ;;  %v3164_v44 = vpack.c.bf16 %v2113_v43, %v2112_v42 }
 0xbc7   : > { %v1912_v7 = vmul.f32 %v4051_v5, %v4051_v5  ;;  %v3136_v47 = vpack.c.bf16 %v2099_v46, %v2098_v45  ;;  %3135 = vmatprep.subr.bf16.mxu1 %v3134_v11  ;;  %v1973_v45 = vld [vmem:[%s3823_s6] sm:$0x3]  ;;  %s4387_s6 = sld [smem:[#allocation28_spill]] (!%p2692_p7) }
 0xbc8   : > { %v1911_v6 = vmul.f32 %v4049_v4, %v4049_v4  ;;  %v1978_v11 = vrot.slane %v1973_v45, %v3905_v17  ;;  %v1982_v46 = vrot.slane %v1973_v45, %v3899_v15 }
 0xbc9   : > { %3137 = vmatpush3.bf16.msra.mxu1 %v3136_v47 }
 0xbca   : > { %1913 = vadd.xlane.f32.xlu1 %v1911_v6  ;;  %3139 = vmatprep.subr.bf16.mxu1 %v3138_v1 }
 0xbce   : > { %1915 = vadd.xlane.f32.xlu1 %v1912_v7  ;;  %v2102_v7 = vld [vmem:[%s3837_s12 + $0x20] sm:$0xff] }
 0xbcf   : > { %v3144_v9 = vpack.c.bf16 %v2103_v8, %v2102_v7 }
 0xc57   : > { %v1914_v48 = vpop.xlane.xlu1 %1913 }
 0xc58   : > { %v1917_v49 = vmul.f32 0.0078125, %v1914_v48 }
 0xc5a   : > { %v1919_v50 = vadd.f32 1e-05, %v1917_v49 }
 0xc5b   : > { %v1916_v51 = vpop.xlane.xlu1 %1915 }
 0xc5c   : > { %3311 = vrsqrt.f32 %v1919_v50  ;;  %v1918_v53 = vmul.f32 0.0078125, %v1916_v51 }
 0xc5e   : > { %v1920_v54 = vadd.f32 1e-05, %v1918_v53 }
 0xc60   : > { %3313 = vrsqrt.f32 %v1920_v54 }
 0xc66   : > { %v3312_v55 = vpop.eup %3311 }
 0xc67   : > { %v1923_v57 = vmul.f32 %v3312_v55, %v4049_v4  ;;  %v3140_v4 = vpack.c.bf16 %v2101_v3, %v2100_v2 }
 0xc69   : > { %v1931_v59 = vmul.f32 %v2687_v56, %v1923_v57  ;;  %3141 = vmatpush3.bf16.msra.mxu1 %v3140_v4 }
 0xc6a   : > { %v3314_v12 = vpop.eup %3313 }
 0xc6b   : > { %v4092_v52 = vadd.f32 %v2688_v58, %v1931_v59  ;;  %v1924_v60 = vmul.f32 %v3314_v12, %v4051_v5  ;;  %v2118_v5 = vld [vmem:[%s3837_s12 + $0xa0] sm:$0xff] }
 0xc6d   : > { %2050 = vmatmul.mubr.f32.vlgmr.msra.gmra.mrb[18].mxu0 %v4092_v52  ;;  %v1932_v61 = vmul.f32 %v2687_v56, %v1924_v60 }
 0xc6e   : > { %2055 = vmatprep.mubr.f32.mxu0 %v3500_v33  ;;  %v2119_v33 = vld [vmem:[%s3837_s12 + $0xa8] sm:$0xff] }
 0xc6f   : > { %v4097_v62 = vadd.f32 %v2688_v58, %v1932_v61  ;;  %v3142_v6 = vpack.c.bf16 %v2119_v33, %v2118_v5 }
 0xc71   : > { %2056 = vmatmul.mubr.f32.gmra.mrb[20].mxu0 %v4097_v62  ;;  %3143 = vmatprep.subr.bf16.mxu1 %v3142_v6 }
 0xc72   : > { %3145 = vmatpush3.bf16.msra.mxu1 %v3144_v9 }
 0xc73   : > { %3147 = vmatprep.subr.bf16.mxu1 %v3146_v14 }
 0xc76   : > { %3149 = vmatpush3.bf16.msra.mxu1 %v3148_v21 }
 0xc77   : > { %3151 = vmatprep.subr.bf16.mxu1 %v3150_v27 }
 0xc7a   : > { %3153 = vmatpush3.bf16.msra.mxu1 %v3152_v31 }
 0xc7b   : > { %3155 = vmatprep.subr.bf16.mxu1 %v3154_v32 }
 0xc7e   : > { %3157 = vmatpush3.bf16.msra.mxu1 %v3156_v34 }
 0xc7f   : > { %3159 = vmatprep.subr.bf16.mxu1 %v3158_v35 }
 0xc82   : > { %3161 = vmatpush3.bf16.msra.mxu1 %v3160_v40 }
 0xc83   : > { %3163 = vmatprep.subr.bf16.mxu1 %v3162_v41 }
 0xc86   : > { %3165 = vmatpush3.bf16.msra.mxu1 %v3164_v44 }
 0xd40   : > { %v2051_v47 = vpop.f32.mrb[18].mxu0 }
 0xd41   : > { %v2052_v48 = vadd.f32 %v2051_v47, %v1978_v11  ;;  %v2053_v49 = vpop.f32.mrb[19].mxu0 }
 0xd42   : > { %v2054_v50 = vadd.f32 %v2053_v49, %v1982_v46 }
 0xd43   : > { %v2066_v51 = vmul.f32 0.044715, %v2052_v48  ;;  %v2062_v19 = vmul.f32 0.5, %v2052_v48 }
 0xd44   : > { %v2067_v53 = vmul.f32 0.044715, %v2054_v50  ;;  %v2057_v54 = vpop.f32.mrb[20].mxu0  ;;  %v2063_v14 = vmul.f32 0.5, %v2054_v50 }
 0xd45   : > { %v2070_v55 = vmul.f32 %v2066_v51, %v2052_v48  ;;  %v2058_v56 = vadd.f32 %v2057_v54, %v1978_v11  ;;  %v2059_v57 = vpop.f32.mrb[21].mxu0  ;;  %v2690_v54 = vld [vmem:[%s847_s27] ss:$0 sm:$0xff] }
 0xd46   : > { %v2071_v58 = vmul.f32 %v2067_v53, %v2054_v50  ;;  %v2060_v59 = vadd.f32 %v2059_v57, %v1982_v46 }
 0xd47   : > { %v2074_v12 = vmul.f32 %v2070_v55, %v2052_v48  ;;  %v2068_v60 = vmul.f32 0.044715, %v2058_v56  ;;  %v2064_v30 = vmul.f32 0.5, %v2058_v56 }
 0xd48   : > { %v2069_v61 = vmul.f32 0.044715, %v2060_v59  ;;  %v2075_v63 = vmul.f32 %v2071_v58, %v2054_v50  ;;  %v2065_v28 = vmul.f32 0.5, %v2060_v59 }
 0xd49   : > { %v2078_v0 = vadd.f32 %v2074_v12, %v2052_v48  ;;  %v2072_v17 = vmul.f32 %v2068_v60, %v2058_v56 }
 0xd4a   : > { %v2073_v1 = vmul.f32 %v2069_v61, %v2060_v59  ;;  %v2079_v15 = vadd.f32 %v2075_v63, %v2054_v50  ;;  %v2265_v63 = vld [vmem:[%s4386_s20] sm:$0xff] (!%p2692_p7) }
 0xd4b   : > { %v2082_v2 = vmul.f32 0.7978846, %v2078_v0  ;;  %v2076_v3 = vmul.f32 %v2072_v17, %v2058_v56  ;;  %v2266_v0 = vld [vmem:[%s4386_s20 + $0x8] sm:$0xff] (!%p2692_p7)  ;;  %v2267_v17 = vld [vmem:[%s4386_s20 + $0x10] sm:$0xff] (!%p2692_p7) }
 0xd4c   : > { %v2083_v4 = vmul.f32 0.7978846, %v2079_v15  ;;  %v2077_v5 = vmul.f32 %v2073_v1, %v2060_v59  ;;  %v3503_v1 = vmov (!%p2692_p7), 0.0|0.0   ;;  %v3167_v15 = vpack.c.bf16 (!%p2692_p7), %v2266_v0, %v2265_v63 }
 0xd4d   : > { %3315 = vtanh.f32 %v2082_v2  ;;  %v2080_v33 = vadd.f32 %v2076_v3, %v2058_v56  ;;  %v2691_v56 = vld [vmem:[%s850_s5] ss:$0 sm:$0xff]  ;;  %3166 = vmatprep.subr.bf16.mxu0 (!%p2692_p7), %v3503_v1  ;;  %v2268_v2 = vld [vmem:[%s4386_s20 + $0x18] sm:$0xff] (!%p2692_p7)  ;;  %v3505_v3 = vmov (!%p2692_p7), 0.0   ;;  %3190 = vmatprep.subr.bf16.mxu1 (!%p2692_p7), %v3503_v1 }
 0xd4e   : > { %3317 = vtanh.f32 %v2083_v4  ;;  %v2081_v6 = vadd.f32 %v2077_v5, %v2060_v59  ;;  %2968 = vmatprep.mubr.msk.f32.mxu0 (!%p2692_p7), %vm3504_vm3, %v3505_v3  ;;  %3168 = vmatpush3.bf16.msra.mxu0 (!%p2692_p7), %v3167_v15  ;;  %v3170_v4 = vpack.c.bf16 (!%p2692_p7), %v2268_v2, %v2267_v17  ;;  %v2269_v5 = vld [vmem:[%s4386_s20 + $0x20] sm:$0xff] (!%p2692_p7) }
 0xd4f   : > { %v2084_v7 = vmul.f32 0.7978846, %v2080_v33  ;;  %3169 = vmatprep.subr.bf16.mxu0 (!%p2692_p7), %v3503_v1  ;;  %v2270_v33 = vld [vmem:[%s4386_s20 + $0x28] sm:$0xff] (!%p2692_p7) }
 0xd50   : > { %v2085_v8 = vmul.f32 0.7978846, %v2081_v6  ;;  %v2359_v6 = vld [vmem:[%s4387_s6] sm:$0xff] (!%p2692_p7) }
 0xd51   : > { %3319 = vtanh.f32 %v2084_v7  ;;  %v2360_v7 = vld [vmem:[%s4387_s6 + $0x8] sm:$0xff] (!%p2692_p7) }
 0xd52   : > { %3321 = vtanh.f32 %v2085_v8  ;;  %v3191_v8 = vpack.c.bf16 (!%p2692_p7), %v2360_v7, %v2359_v6  ;;  %3171 = vmatpush3.bf16.msra.mxu0 (!%p2692_p7), %v3170_v4 }
 0xd53   : > { %3172 = vmatprep.subr.bf16.mxu0 (!%p2692_p7), %v3503_v1 }
 0xd57   : > { %v3316_v9 = vpop.eup %3315 }
 0xd58   : > { %v3318_v10 = vpop.eup %3317  ;;  %v2090_v13 = vadd.f32 1.0, %v3316_v9  ;;  %v2361_v9 = vld [vmem:[%s4387_s6 + $0x10] sm:$0xff] (!%p2692_p7) }
 0xd59   : > { %v2091_v16 = vadd.f32 1.0, %v3318_v10  ;;  %v2362_v10 = vld [vmem:[%s4387_s6 + $0x18] sm:$0xff] (!%p2692_p7) }
 0xd5a   : > { %v2094_v26 = vmul.f32 %v2090_v13, %v2062_v19  ;;  %v3173_v13 = vpack.c.bf16 (!%p2692_p7), %v2270_v33, %v2269_v5  ;;  %v3194_v19 = vpack.c.bf16 (!%p2692_p7), %v2362_v10, %v2361_v9 }
 0xd5b   : > { %v3320_v21 = vpop.eup %3319  ;;  %v2095_v22 = vmul.f32 %v2091_v16, %v2063_v14  ;;  %v2271_v14 = vld [vmem:[%s4386_s20 + $0x30] sm:$0xff] (!%p2692_p7)  ;;  %v2272_v16 = vld [vmem:[%s4386_s20 + $0x38] sm:$0xff] (!%p2692_p7) }
 0xd5c   : > { %v3322_v23 = vpop.eup %3321  ;;  %v2092_v27 = vadd.f32 1.0, %v3320_v21  ;;  %v2363_v21 = vld [vmem:[%s4387_s6 + $0x20] sm:$0xff] (!%p2692_p7)  ;;  %3174 = vmatpush3.bf16.msra.mxu0 (!%p2692_p7), %v3173_v13 }
 0xd5d   : > { %2201 = vmatprep.mubr.f32.mxu1 %v2095_v22  ;;  %v2093_v29 = vadd.f32 1.0, %v3322_v23  ;;  %v2364_v22 = vld [vmem:[%s4387_s6 + $0x28] sm:$0xff] (!%p2692_p7)  ;;  %v3176_v23 = vpack.c.bf16 (!%p2692_p7), %v2272_v16, %v2271_v14  ;;  %3175 = vmatprep.subr.bf16.mxu0 (!%p2692_p7), %v3503_v1 }
 0xd5e   : > { %2202 = vmatmul.mubr.f32.vlgmr.msra.gmra.mrb[6].mxu1 %v2094_v26  ;;  %v2096_v32 = vmul.f32 %v2092_v27, %v2064_v30  ;;  %v2273_v26 = vld [vmem:[%s4386_s20 + $0x40] sm:$0xff] (!%p2692_p7)  ;;  %v2274_v27 = vld [vmem:[%s4386_s20 + $0x48] sm:$0xff] (!%p2692_p7)  ;;  %v2366_v30 = vld [vmem:[%s4387_s6 + $0x38] sm:$0xff] (!%p2692_p7) }
 0xd5f   : > { %v2097_v31 = vmul.f32 %v2093_v29, %v2065_v28  ;;  %3192 = vmatpush3.bf16.msra.mxu1 (!%p2692_p7), %v3191_v8  ;;  %v3197_v28 = vpack.c.bf16 (!%p2692_p7), %v2364_v22, %v2363_v21  ;;  %v2365_v29 = vld [vmem:[%s4387_s6 + $0x30] sm:$0xff] (!%p2692_p7) }
 0xd60   : > { %3193 = vmatprep.subr.bf16.mxu1 (!%p2692_p7), %v3503_v1  ;;  %3177 = vmatpush3.bf16.msra.mxu0 (!%p2692_p7), %v3176_v23 }
 0xd61   : > { %2206 = vmatprep.mubr.f32.mxu1 %v2097_v31  ;;  %v3179_v31 = vpack.c.bf16 (!%p2692_p7), %v2274_v27, %v2273_v26  ;;  %3178 = vmatprep.subr.bf16.mxu0 (!%p2692_p7), %v3503_v1 }
 0xd62   : > { %2207 = vmatmul.mubr.f32.gmra.mrb[8].mxu1 %v2096_v32  ;;  %v2275_v32 = vld [vmem:[%s4386_s20 + $0x50] sm:$0xff] (!%p2692_p7) }
 0xd63   : > { %3003 = vmatprep.mubr.msk.f32.mxu1 (!%p2692_p7), %vm3504_vm3, %v3505_v3  ;;  %3195 = vmatpush3.bf16.msra.mxu1 (!%p2692_p7), %v3194_v19 }
 0xd64   : > { %3196 = vmatprep.subr.bf16.mxu1 (!%p2692_p7), %v3503_v1  ;;  %3180 = vmatpush3.bf16.msra.mxu0 (!%p2692_p7), %v3179_v31 }
 0xd65   : > { %3181 = vmatprep.subr.bf16.mxu0 (!%p2692_p7), %v3503_v1 }
 0xd67   : > { %3198 = vmatpush3.bf16.msra.mxu1 (!%p2692_p7), %v3197_v28 }
 0xd68   : > { %3199 = vmatprep.subr.bf16.mxu1 (!%p2692_p7), %v3503_v1 }
 0xe31   : > { %v2786_v18 = vpop.f32.mrb[6].mxu1 }
 0xe32   : > { %v2787_v20 = vpop.f32.mrb[7].mxu1 }
 0xe33   : > { %v2788_v24 = vadd.f32 %v2787_v20, %v2786_v18  ;;  %v2276_v18 = vld [vmem:[%s4386_s20 + $0x58] sm:$0xff] (!%p2692_p7)  ;;  %v2367_v20 = vld [vmem:[%s4387_s6 + $0x40] sm:$0xff] (!%p2692_p7) }
 0xe35   : > { %v2204_v34 = vadd.f32 %v2788_v24, %v2689_v25  ;;  %v2789_v35 = vpop.f32.mrb[8].mxu1  ;;  %v2368_v24 = vld [vmem:[%s4387_s6 + $0x48] sm:$0xff] (!%p2692_p7) }
 0xe36   : > { %v2790_v36 = vpop.f32.mrb[9].mxu1 }
 0xe37   : > { %v2791_v37 = vadd.f32 %v2790_v36, %v2789_v35  ;;  %v2212_v38 = vadd.f32 %v2204_v34, %v4092_v52  ;;  %v3182_v34 = vpack.c.bf16 (!%p2692_p7), %v2276_v18, %v2275_v32  ;;  %v2277_v35 = vld [vmem:[%s4386_s20 + $0x60] sm:$0xff] (!%p2692_p7)  ;;  %v2278_v36 = vld [vmem:[%s4386_s20 + $0x68] sm:$0xff] (!%p2692_p7) }
 0xe39   : > { %v2209_v39 = vadd.f32 %v2791_v37, %v2689_v25  ;;  %2216 = vadd.xlane.f32.xlu1 %v2212_v38  ;;  %v3200_v25 = vpack.c.bf16 (!%p2692_p7), %v2366_v30, %v2365_v29  ;;  %v3203_v37 = vpack.c.bf16 (!%p2692_p7), %v2368_v24, %v2367_v20  ;;  %3183 = vmatpush3.bf16.msra.mxu0 (!%p2692_p7), %v3182_v34 }
 0xe3a   : > { %3184 = vmatprep.subr.bf16.mxu0 (!%p2692_p7), %v3503_v1 }
 0xe3b   : > { %v2213_v40 = vadd.f32 %v2209_v39, %v4097_v62  ;;  %3201 = vmatpush3.bf16.msra.mxu1 (!%p2692_p7), %v3200_v25  ;;  %v2370_v39 = vld [vmem:[%s4387_s6 + $0x58] sm:$0xff] (!%p2692_p7) }
 0xe3c   : > { %3202 = vmatprep.subr.bf16.mxu1 (!%p2692_p7), %v3503_v1 }
 0xe3d   : > { %2218 = vadd.xlane.f32.xlu1 %v2213_v40 }
 0xe3f   : > { %3204 = vmatpush3.bf16.msra.mxu1 (!%p2692_p7), %v3203_v37 }
 0xe40   : > { %3205 = vmatprep.subr.bf16.mxu1 (!%p2692_p7), %v3503_v1 }
 0xec6   : > { %v2217_v41 = vpop.xlane.xlu1 %2216 }
 0xec7   : > { %v2220_v42 = vmul.f32 0.0078125, %v2217_v41  ;;  %v2279_v41 = vld [vmem:[%s4386_s20 + $0x70] sm:$0xff] (!%p2692_p7) }
 0xec9   : > { %v2222_v43 = vsub.f32 %v2212_v38, %v2220_v42  ;;  %v2369_v38 = vld [vmem:[%s4387_s6 + $0x50] sm:$0xff] (!%p2692_p7)  ;;  %v2280_v42 = vld [vmem:[%s4386_s20 + $0x78] sm:$0xff] (!%p2692_p7) }
 0xeca   : > { %v2219_v44 = vpop.xlane.xlu1 %2218 }
 0xecb   : > { %v2221_v45 = vmul.f32 0.0078125, %v2219_v44  ;;  %v2224_v11 = vmul.f32 %v2222_v43, %v2222_v43  ;;  %v2371_v44 = vld [vmem:[%s4387_s6 + $0x60] sm:$0xff] (!%p2692_p7) }
 0xecd   : > { %v2223_v46 = vsub.f32 %v2213_v40, %v2221_v45  ;;  %2226 = vadd.xlane.f32.xlu1 %v2224_v11  ;;  %v3185_v40 = vpack.c.bf16 (!%p2692_p7), %v2278_v36, %v2277_v35  ;;  %v2372_v45 = vld [vmem:[%s4387_s6 + $0x68] sm:$0xff] (!%p2692_p7)  ;;  %v3188_v11 = vpack.c.bf16 (!%p2692_p7), %v2280_v42, %v2279_v41 }
 0xecf   : > { %v2225_v47 = vmul.f32 %v2223_v46, %v2223_v46  ;;  %3186 = vmatpush3.bf16.msra.mxu0 (!%p2692_p7), %v3185_v40 }
 0xed0   : > { %3187 = vmatprep.subr.bf16.mxu0 (!%p2692_p7), %v3503_v1 }
 0xed1   : > { %2228 = vadd.xlane.f32.xlu0 %v2225_v47  ;;  %v3209_v47 = vpack.c.bf16 (!%p2692_p7), %v2372_v45, %v2371_v44 }
 0xed3   : > { %3189 = vmatpush3.bf16.msra.mxu0 (!%p2692_p7), %v3188_v11 }
 0xf5a   : > { %v2227_v48 = vpop.xlane.xlu1 %2226 }
 0xf5b   : > { %v2230_v49 = vmul.f32 0.0078125, %v2227_v48 }
 0xf5d   : > { %v2232_v52 = vadd.f32 1e-05, %v2230_v49  ;;  %v2373_v49 = vld [vmem:[%s4387_s6 + $0x70] sm:$0xff] (!%p2692_p7) }
 0xf5e   : > { %v2229_v50 = vpop.xlane.xlu0 %2228 }
 0xf5f   : > { %3323 = vrsqrt.f32 %v2232_v52  ;;  %v2231_v51 = vmul.f32 0.0078125, %v2229_v50  ;;  %v2374_v52 = vld [vmem:[%s4387_s6 + $0x78] sm:$0xff] (!%p2692_p7) }
 0xf60   : > { %v3212_v50 = vpack.c.bf16 (!%p2692_p7), %v2374_v52, %v2373_v49 }
 0xf61   : > { %v2233_v62 = vadd.f32 1e-05, %v2231_v51  ;;  %v2693_v51 = vld [vmem:[%s4388_s18] ss:$0 sm:$0xff] (!%p2692_p7) }
 0xf63   : > { %3325 = vrsqrt.f32 %v2233_v62 }
 0xf69   : > { %v3324_v53 = vpop.eup %3323 }
 0xf6a   : > { %v2236_v55 = vmul.f32 %v3324_v53, %v2222_v43  ;;  %v3206_v43 = vpack.c.bf16 (!%p2692_p7), %v2370_v39, %v2369_v38 }
 0xf6c   : > { %v2244_v57 = vmul.f32 %v2690_v54, %v2236_v55  ;;  %3207 = vmatpush3.bf16.msra.mxu1 (!%p2692_p7), %v3206_v43 }
 0xf6d   : > { %v3326_v58 = vpop.eup %3325  ;;  %3208 = vmatprep.subr.bf16.mxu1 (!%p2692_p7), %v3503_v1 }
 0xf6e   : > { %v4148_v59 = vadd.f32 %v2691_v56, %v2244_v57  ;;  %v2237_v12 = vmul.f32 %v3326_v58, %v2223_v46  ;;  %2259 = sbr.rel (%p2692_p7) target bundleno = 4704 (0x1260), region = 120 }
 0xf70   : > { %2254 = vst [vmem:[#allocation2] sm:$0xff] %v4148_v59  ;;  %v2245_v60 = vmul.f32 %v2690_v54, %v2237_v12  ;;  %3210 = vmatpush3.bf16.msra.mxu1 (!%p2692_p7), %v3209_v47 }
 0xf71   : > { %3211 = vmatprep.subr.bf16.mxu1 (!%p2692_p7), %v3503_v1 }
 0xf72   : > { %v4151_v61 = vadd.f32 %v2691_v56, %v2245_v60  ;;  %v2694_v56 = vld [vmem:[%s4389_s23] ss:$0 sm:$0xff] (!%p2692_p7) }
 0xf74   : > { %2255 = vst [vmem:[#allocation2 + $0x8] sm:$0xff] %v4151_v61  ;;  %v2261_v46 = vrot.slane (!%p2692_p7), %v4151_v61, 7  ;;  %3213 = vmatpush3.bf16.msra.mxu1 (!%p2692_p7), %v3212_v50 }
 0xf76   : > { %v2264_v48 = vsel %vm2263_vm4, %v4148_v59, %v2261_v46 }
 0xf77   : > { %2969 = vmatmul.mubr.f32.vlgmr.msra.gmra.mrb[0].mxu0 %v2264_v48 }
0x104a   : > { %v2354_v62 = vpop.f32.mrb[0].mxu0 }
0x104b   : > { %v2355_v53 = vadd.f32 %v2693_v51, %v2354_v62  ;;  %v2970_v54 = vpop.f32.mrb[1].mxu0 }
0x104d   : > { %v2358_v55 = vmax.f32 %v2355_v53, 0.0 }
0x104f   : > { %3004 = vmatmul.mubr.f32.vlgmr.msra.gmra.mrb[0].mxu1 %v2358_v55 }
0x1122   : > { %v2448_v57 = vpop.f32.mrb[0].mxu1 }
0x1123   : > { %v2449_v58 = vadd.f32 %v2694_v56, %v2448_v57  ;;  %v3005_v59 = vpop.f32.mrb[1].mxu1 }
0x1125   : > { %v2453_v12 = vsel %vm2452_vm5, %v2449_v58, -inf }
0x1126   : > { %2454 = vmax.xlane.f32.xlu0 %v2453_v12 }
0x11b3   : > { %v2455_v60 = vpop.xlane.xlu0 %2454 }
0x11b4   : > { %v2456_v61 = vsub.f32 %v2449_v58, %v2455_v60 }
0x11b6   : > { %v2457_v63 = vmul.f32 1.442695, %v2456_v61 }
0x11b8   : > { %3327 = vpow2.f32 %v2457_v63 }
0x11c2   : > { %v3328_v0 = vpop.eup %3327 }
0x11c3   : > { %v2459_v17 = vsel %vm2452_vm5, %v3328_v0, 0.0 }
0x11c4   : > { %2460 = vadd.xlane.f32.xlu0 %v2459_v17 }
0x1251   : > { %v2461_v1 = vpop.xlane.xlu0 %2460 }
0x1252   : > { %3329 = vrcp.f32 %v2461_v1 }
0x125c   : > { %v3330_v15 = vpop.eup %3329 }
0x125d   : > { %v2463_v2 = vmul.f32 %v3330_v15, %v3328_v0 }
0x125f   : > { %2464 = vst.msk [vmem:[#allocation9] sm:$0x3] %vm2452_vm5, %v2463_v2 }
0x1260 PF: > { %p3239_p12 = scmp.eq.s32.totalorder %s3631_s2, 1  ;;  %s3506_s30 = smov [#allocation9]  }
0x1261   : > { %s2472_s29 = sshll.u32 %s3506_s30, 4  ;;  %s2473_s29 = int_to_ptr.vmem [resolvable:$true] %s2472_s29 }
0x1262   : > { %s3421_s15 = scalar_lea.vmem %s2473_s29, 32  ;;  %p3428_p6 = scmp.lt.s32.totalorder %s2473_s29, %s2473_s29 }
0x1263   : > { %p3422_p2 = scmp.ne.s32.totalorder %s2473_s29, %s3421_s15  ;;  %p3429_p4 = scmp.lt.s32.totalorder %s3421_s15, %s3421_s15 }
0x1265   : > { %p3423_p3 = pnand %p3422_p2, %p3239_p12  ;;  %p3430_p1 = por %p3429_p4, %p3428_p6 }
0x1267   : > { %p3424_p5 = pneg %p3423_p3 }
0x1269   : > { %p3431_p11 = pnand %p3430_p1, %p3424_p5 }
0x126b   : > { %3434 = shalt.err (!%p3431_p11)
}
0x126c   : > { %s4390_s19 = sld [smem:[#allocation30_spill]] }
0x1272   : > { %s3435_s12 = scalar_lea.hbm %s4390_s19, 32 }
0x1273   : > { %p3436_p13 = scmp.ne.s32.totalorder %s4390_s19, %s3435_s12  ;;  %p3441_p8 = scmp.lt.u32.totalorder %s3435_s12, %s4390_s19 }
0x1275   : > { %p3437_p10 = pnand %p3436_p13, %p3239_p12 }
0x1277   : > { %p3438_p9 = pneg %p3437_p10 }
0x1279   : > { %p3443_p0 = pnand %p3441_p8, %p3438_p9 }
0x127b   : > { %3446 = shalt.err (!%p3443_p0)
}
0x127c   : > { %3225 = dma.vmem_to_hbm [thread:$0]  (%p3239_p12), %s2473_s29, 32, %s4390_s19, [#allocation5]  }
0x127d   : > { %3472 = dma.done.wait (%p3239_p12), [#allocation5], 32  }
0x127e   : > { %3474 = vsyncadd (%p3239_p12), [#allocation5], 4294967264 }
0x127f PF: > { %s4391_s24 = sld [smem:[#allocation14_spill]]  ;;  %s4392_s16 = sld [smem:[#allocation13_spill]] }
0x1280   : > { %s4393_s23 = sld [smem:[#allocation15_spill]]  ;;  %s4394_s1 = smov %s3481_s22 }
0x1285   : > { %p34_p7 = scmp.ge.s32.totalorder %s4391_s24, 4   ;;  %s4395_s22 = smov %s4392_s16 }
0x1287   :  { %36 = sbr.rel (!%p34_p7) target bundleno = 22 (0x16), region = 196 }
0x128e   :  { %2485 = vsyncpa [#allocation4], 1 }
0x128f   :  { %2487 = vsyncpa [#allocation4 + $0x1], 1 }
0x1290   :  { %2488 = vsyncpa [#allocation7], 1 }
0x1291   :  { %2490 = vsyncpa [#allocation7 + $0x1], 1 }
0x1292   :  { %2491 = vsyncpa [#allocation5], 1 }
0x1293   :  { %2493 = vsyncpa [#allocation5 + $0x1], 1 }

</bundles_post_ra>
